<compile_context>
chip_gen: v5e
topology: v5e:2x2
jax: 0.10.0
libtpu: 0.0.40
codegen_flags: <defaults>
</compile_context>

<pallas_src>
import math

import numpy as np
import jax
import jax.numpy as jnp
from jax.experimental import pallas as pl
from jax.experimental.pallas import tpu as pltpu

# ----------------------------- configuration --------------------------------
IN_HIDDEN = 32          # in_hidden_channels (divisible by 8)
MID_HIDDEN = 32         # mid_hidden_channels
OUT_HIDDEN = 16         # out_hidden_channels
EMB_SIZE = 8            # embedding_size
LAT = 4                 # sphere_size_lat
LONG = 8                # sphere_size_long (even)
MAX_ELEM = 10           # max_num_elements
NUM_BASIS = 8           # num_embedding_basis (fixed to 8 in the module)
NUM_GROUPS = IN_HIDDEN // 8
GN_EPS = 1e-5

G = NUM_GROUPS                      # conv groups
OG = MID_HIDDEN // G                # conv out-channels per group
IG = (IN_HIDDEN * LAT) // G         # conv in-channels per group
C_CONV = IN_HIDDEN * LAT            # conv input channels (128)
CL = LAT * LONG * IN_HIDDEN         # flattened per-node sphere (1024)
CONV_OUT = LONG * MID_HIDDEN        # folded conv output width (256)
OUT_PAD = 32                        # lane-padded output width (>= OUT_HIDDEN)

MAX_TILE_N = 256                    # per-tile node count; ~1 MiB/input block in
                                    # bf16 -> fits v5e/v6e/v7x scoped VMEM easily


def _round_up(x, m):
    return ((x + m - 1) // m) * m


def _pack_offsets(sizes):
    """8-row-aligned offsets for packing 2-D params into one slab."""
    offs, cur = [], 0
    for s in sizes:
        offs.append(cur)
        cur += _round_up(s, 8)
    return offs, _round_up(cur, 8)


# slab of width 32 (f32): pool matrix, GN matrices/affine, embed_fc1 (block
# diag), fc1 + fc3(tiled) + biases of both embedding blocks.
(_O32_POOL, _O32_GAVG, _O32_GAMMA, _O32_BETA, _O32_WEBD, _O32_BEBD,
 _O32_B1W1, _O32_B1B1, _O32_B1W3, _O32_B1B3,
 _O32_B2W1, _O32_B2B1, _O32_B2W3, _O32_B2B3), S32_ROWS = _pack_offsets(
    [LONG * MID_HIDDEN, MID_HIDDEN, 1, 1, 4 * EMB_SIZE, 1,
     MID_HIDDEN, 1, NUM_BASIS * MID_HIDDEN, 1,
     MID_HIDDEN, 1, NUM_BASIS * MID_HIDDEN, 1])

# slab of width 256 (f32): tiled conv bias, basis-expansion matrix, fc2 + bias
# of both embedding blocks.
(_O256_CONVB, _O256_BEXP, _O256_B1W2, _O256_B1B2,
 _O256_B2W2, _O256_B2B2), S256_ROWS = _pack_offsets(
    [1, NUM_BASIS, MID_HIDDEN, 1, MID_HIDDEN, 1])


def _silu(x):
    return x * jax.nn.sigmoid(x)


# ----------------------------- fused kernel ----------------------------------
def _embedding_block(x, logits, bexp, w1, b1, w2, b2, w3t, b3):
    """EmbeddingBlock: softmax(basis logits), fc1->act->fc2->act, basis-weighted
    sum folded into fc3 (w3t pre-tiled across the 8 basis slots)."""
    e = jnp.exp(logits - jnp.max(logits, axis=1, keepdims=True))
    e = e * pl.reciprocal(jnp.sum(e, axis=1, keepdims=True), approx=True)
    h = _silu(jnp.dot(x, w1, preferred_element_type=jnp.float32) + b1)   # (n, mid)
    h = _silu(jnp.dot(h, w2, preferred_element_type=jnp.float32) + b2)   # (n, 8*mid)
    e_exp = jnp.dot(e, bexp, preferred_element_type=jnp.float32)         # (n, 8*mid)
    return jnp.dot(h * e_exp, w3t, preferred_element_type=jnp.float32) + b3


def force_output_kernel(xf_ref, emb_ref, wbig_ref, s32_ref, s256_ref, o_ref):
    # --- SpinConvBlock: circular grouped conv folded into ONE bf16 matmul ----
    # conv[n, t*MID + o] = conv1d output channel o at circular position t.
    conv = jnp.dot(xf_ref[...], wbig_ref[...],
                   preferred_element_type=jnp.float32)                    # (n, 256)
    conv = conv + s256_ref[_O256_CONVB:_O256_CONVB + 1, :]
    conv = _silu(conv)

    # AvgPool1d(LONG) over the 8 positions: tiny static (256, 32) matmul (1/L).
    pool = s32_ref[_O32_POOL:_O32_POOL + LONG * MID_HIDDEN, :]
    acc = jnp.dot(conv, pool, preferred_element_type=jnp.float32)         # (n, 32)

    # --- GroupNorm(NUM_GROUPS, MID) via block-diag group-average matmuls -----
    gavg = s32_ref[_O32_GAVG:_O32_GAVG + MID_HIDDEN, :]
    mean = jnp.dot(acc, gavg, preferred_element_type=jnp.float32)
    ex2 = jnp.dot(acc * acc, gavg, preferred_element_type=jnp.float32)
    var = ex2 - mean * mean
    h = (acc - mean) * jax.lax.rsqrt(var + GN_EPS)
    h = (h * s32_ref[_O32_GAMMA:_O32_GAMMA + 1, :]
         + s32_ref[_O32_BETA:_O32_BETA + 1, :])

    # --- basis logits for BOTH embedding blocks (block-diag embed_fc1) -------
    e_all = (jnp.dot(emb_ref[...], s32_ref[_O32_WEBD:_O32_WEBD + 4 * EMB_SIZE, :],
                     preferred_element_type=jnp.float32)
             + s32_ref[_O32_BEBD:_O32_BEBD + 1, :])                       # (n, 32)
    bexp = s256_ref[_O256_BEXP:_O256_BEXP + NUM_BASIS, :]

    # --- EmbeddingBlock 1 + inter-block activation ----------------------------
    h = _embedding_block(
        h, e_all[:, 0:NUM_BASIS], bexp,
        s32_ref[_O32_B1W1:_O32_B1W1 + MID_HIDDEN, :],
        s32_ref[_O32_B1B1:_O32_B1B1 + 1, :],
        s256_ref[_O256_B1W2:_O256_B1W2 + MID_HIDDEN, :],
        s256_ref[_O256_B1B2:_O256_B1B2 + 1, :],
        s32_ref[_O32_B1W3:_O32_B1W3 + NUM_BASIS * MID_HIDDEN, :],
        s32_ref[_O32_B1B3:_O32_B1B3 + 1, :])
    h = _silu(h)

    # --- EmbeddingBlock 2 (output lane-padded 16 -> 32, sliced in wrapper) ----
    out = _embedding_block(
        h, e_all[:, NUM_BASIS:2 * NUM_BASIS], bexp,
        s32_ref[_O32_B2W1:_O32_B2W1 + MID_HIDDEN, :],
        s32_ref[_O32_B2B1:_O32_B2B1 + 1, :],
        s256_ref[_O256_B2W2:_O256_B2W2 + MID_HIDDEN, :],
        s256_ref[_O256_B2B2:_O256_B2B2 + 1, :],
        s32_ref[_O32_B2W3:_O32_B2W3 + NUM_BASIS * MID_HIDDEN, :],
        s32_ref[_O32_B2B3:_O32_B2B3 + 1, :])
    o_ref[...] = out


# ----------------------------- wrapper ---------------------------------------
def force_output_block(params, x, out_size, target_element,
                       proj_index, proj_delta, proj_src_index):
    # --- ProjectLatLongSphere ---------------------------------------------------
    # TODO(synk): the index_add is a data-dependent scatter; it stays in XLA
    # (all 4 taps fused into a SINGLE scatter).  Its output feeds the kernel
    # as a zero-copy reshape — no transpose / circular-pad / stack needed,
    # because that permutation is folded into the conv weight at init.
    splat = x[proj_src_index]                                          # (P, C)
    vals = (splat[None, :, :] * proj_delta[:, :, None]).reshape(-1, IN_HIDDEN)
    xp = jnp.zeros((out_size * LAT * LONG, IN_HIDDEN), jnp.float32)
    xp = xp.at[proj_index.reshape(-1)].add(vals)
    xf = xp.reshape(out_size, CL)                                      # (N, 1024)

    # --- embedding lookups (data-dependent gathers, plain JAX) ------------------
    # TODO(synk): embedding-table gathers stay in XLA.
    te = target_element
    b1, b2 = params['block1'], params['block2']
    embcat = jnp.concatenate([b1['src_emb'][te], b1['tgt_emb'][te],
                              b2['src_emb'][te], b2['tgt_emb'][te]], axis=1)  # (N, 32)

    # --- pad / tile the node dim (16-aligned for bf16 sublane packing) ----------
    # NOTE: out_size is static, so distinct out_size values recompile; bucket
    # out_size at the call site for varying-N inference workloads.
    tile_n = min(MAX_TILE_N, _round_up(out_size, 16))
    n_pad = _round_up(out_size, tile_n)
    if n_pad > out_size:
        pad = n_pad - out_size
        xf = jnp.pad(xf, ((0, pad), (0, 0)))
        embcat = jnp.pad(embcat, ((0, pad), (0, 0)))

    xf = xf.astype(jnp.bfloat16)     # halves dominant HBM read; f32 MXU accum

    ins = (xf, embcat, params['wbig'], params['slab32'], params['slab256'])
    in_specs = [
        pl.BlockSpec((tile_n, CL), lambda i: (i, 0)),                 # x_flat
        pl.BlockSpec((tile_n, 4 * EMB_SIZE), lambda i: (i, 0)),       # embcat
        pl.BlockSpec((CL, CONV_OUT), lambda i: (0, 0)),               # folded conv W
        pl.BlockSpec((S32_ROWS, MID_HIDDEN), lambda i: (0, 0)),       # packed slab 32
        pl.BlockSpec((S256_ROWS, NUM_BASIS * MID_HIDDEN), lambda i: (0, 0)),
    ]

    out = pl.pallas_call(
        force_output_kernel,
        out_shape=jax.ShapeDtypeStruct((n_pad, OUT_PAD), jnp.float32),
        grid=(n_pad // tile_n,),
        in_specs=in_specs,
        out_specs=pl.BlockSpec((tile_n, OUT_PAD), lambda i: (i, 0)),
        compiler_params=pltpu.CompilerParams(
            dimension_semantics=("parallel",)),
    )(*ins)
    return out[:out_size, :OUT_HIDDEN]


# ----------------------------- parameter init --------------------------------
def _linear_np(key, fan_in, fan_out):
    lim = 1.0 / math.sqrt(fan_in)
    kw, kb = jax.random.split(key)
    w = np.asarray(jax.random.uniform(kw, (fan_in, fan_out), jnp.float32, -lim, lim))
    b = np.asarray(jax.random.uniform(kb, (fan_out,), jnp.float32, -lim, lim))
    return w, b


def _embedding_block_np(key, out_ch):
    ks = jax.random.split(key, 6)
    w1, b1 = _linear_np(ks[0], MID_HIDDEN, MID_HIDDEN)
    w2, b2 = _linear_np(ks[1], MID_HIDDEN, NUM_BASIS * MID_HIDDEN)
    w3, b3 = _linear_np(ks[2], MID_HIDDEN, out_ch)
    we, be = _linear_np(ks[3], 2 * EMB_SIZE, NUM_BASIS)
    src = jax.random.uniform(ks[4], (MAX_ELEM, EMB_SIZE), jnp.float32, -1e-4, 1e-4)
    tgt = jax.random.uniform(ks[5], (MAX_ELEM, EMB_SIZE), jnp.float32, -1e-4, 1e-4)
    return dict(w1=w1, b1=b1, w2=w2, b2=b2, w3=w3, b3=b3, we=we, be=be,
                src_emb=src, tgt_emb=tgt)


def init_params(key):
    ks = jax.random.split(key, 3)

    # ---- Conv1d(C*LAT -> MID, k=LONG, groups=G, circular padding LONG//2) ----
    fan_in = IG * LONG
    lim = 1.0 / math.sqrt(fan_in)
    kw, kb = jax.random.split(ks[0])
    conv_w = np.asarray(jax.random.uniform(kw, (MID_HIDDEN, IG, LONG),
                                           jnp.float32, -lim, lim))
    conv_b = np.asarray(jax.random.uniform(kb, (MID_HIDDEN,), jnp.float32, -lim, lim))

    # Fold the 8 circular-window rotations AND the (N,lat,long,C)->(N,C*lat,long)
    # layout permutation into one (1024, 256) weight:
    #   conv_out[n, t*MID + o] = sum_r x_flat[n, r] * W_big[r, t*MID + o]
    # where r = lat*LONG*C + lng*C + ci (the scatter output's natural flatten).
    P = LONG // 2
    o = np.arange(MID_HIDDEN)[None, None, None, None, :]
    lat = np.arange(LAT)[:, None, None, None, None]
    lng = np.arange(LONG)[None, :, None, None, None]
    ci = np.arange(IN_HIDDEN)[None, None, :, None, None]
    t = np.arange(LONG)[None, None, None, :, None]
    c_conv = ci * LAT + lat                      # PyTorch conv channel index
    grp = o // OG
    in_group = (c_conv // IG) == grp
    c_loc = np.clip(c_conv - grp * IG, 0, IG - 1)
    k = (lng - t + P) % LONG                     # circular tap that reads lng at pos t
    wbig = np.where(in_group, conv_w[o, c_loc, k], 0.0).astype(np.float32)
    wbig = wbig.reshape(CL, CONV_OUT)            # (1024, 256)

    blk1 = _embedding_block_np(ks[1], MID_HIDDEN)
    blk2 = _embedding_block_np(ks[2], OUT_HIDDEN)

    # ---- small structural constants ------------------------------------------
    cg = MID_HIDDEN // NUM_GROUPS
    pool = np.zeros((LONG * MID_HIDDEN, MID_HIDDEN), np.float32)
    rows = np.arange(LONG * MID_HIDDEN)
    pool[rows, rows % MID_HIDDEN] = 1.0 / LONG                     # exact AvgPool
    cidx = np.arange(MID_HIDDEN)
    gavg = ((cidx[:, None] // cg) == (cidx[None, :] // cg)).astype(np.float32) / cg
    bexp = np.zeros((NUM_BASIS, NUM_BASIS * MID_HIDDEN), np.float32)
    cols = np.arange(NUM_BASIS * MID_HIDDEN)
    bexp[cols // MID_HIDDEN, cols] = 1.0

    # block-diagonal embed_fc1 for both blocks (cols 0:8 block1, 8:16 block2)
    we_bd = np.zeros((4 * EMB_SIZE, MID_HIDDEN), np.float32)
    we_bd[0:2 * EMB_SIZE, 0:NUM_BASIS] = blk1['we']
    we_bd[2 * EMB_SIZE:, NUM_BASIS:2 * NUM_BASIS] = blk2['we']
    be_bd = np.zeros((MID_HIDDEN,), np.float32)
    be_bd[0:NUM_BASIS] = blk1['be']
    be_bd[NUM_BASIS:2 * NUM_BASIS] = blk2['be']

    # fc3 pre-tiled across the 8 basis slots; block2 lane-padded 16 -> 32
    w3t_1 = np.tile(blk1['w3'], (NUM_BASIS, 1))                     # (256, 32)
    w3t_2 = np.zeros((NUM_BASIS * MID_HIDDEN, OUT_PAD), np.float32)
    w3t_2[:, :OUT_HIDDEN] = np.tile(blk2['w3'], (NUM_BASIS, 1))
    b3_2 = np.zeros((OUT_PAD,), np.float32)
    b3_2[:OUT_HIDDEN] = blk2['b3']

    # ---- pack everything small into two broadcast slabs -----------------------
    slab32 = np.zeros((S32_ROWS, MID_HIDDEN), np.float32)
    slab32[_O32_POOL:_O32_POOL + LONG * MID_HIDDEN] = pool
    slab32[_O32_GAVG:_O32_GAVG + MID_HIDDEN] = gavg
    slab32[_O32_GAMMA] = 1.0                   # GroupNorm gamma (default init)
    slab32[_O32_BETA] = 0.0                    # GroupNorm beta
    slab32[_O32_WEBD:_O32_WEBD + 4 * EMB_SIZE] = we_bd
    slab32[_O32_BEBD] = be_bd
    slab32[_O32_B1W1:_O32_B1W1 + MID_HIDDEN] = blk1['w1']
    slab32[_O32_B1B1] = blk1['b1']
    slab32[_O32_B1W3:_O32_B1W3 + NUM_BASIS * MID_HIDDEN] = w3t_1
    slab32[_O32_B1B3] = blk1['b3']
    slab32[_O32_B2W1:_O32_B2W1 + MID_HIDDEN] = blk2['w1']
    slab32[_O32_B2B1] = blk2['b1']
    slab32[_O32_B2W3:_O32_B2W3 + NUM_BASIS * MID_HIDDEN] = w3t_2
    slab32[_O32_B2B3] = b3_2

    slab256 = np.zeros((S256_ROWS, NUM_BASIS * MID_HIDDEN), np.float32)
    slab256[_O256_CONVB] = np.tile(conv_b, LONG)   # bias at column t*MID + o
    slab256[_O256_BEXP:_O256_BEXP + NUM_BASIS] = bexp
    slab256[_O256_B1W2:_O256_B1W2 + MID_HIDDEN] = blk1['w2']
    slab256[_O256_B1B2] = blk1['b2']
    slab256[_O256_B2W2:_O256_B2W2 + MID_HIDDEN] = blk2['w2']
    slab256[_O256_B2B2] = blk2['b2']

    return {
        'wbig': jnp.asarray(wbig, jnp.bfloat16),
        'slab32': jnp.asarray(slab32),
        'slab256': jnp.asarray(slab256),
        'block1': {'src_emb': jnp.asarray(blk1['src_emb']),
                   'tgt_emb': jnp.asarray(blk1['tgt_emb'])},
        'block2': {'src_emb': jnp.asarray(blk2['src_emb']),
                   'tgt_emb': jnp.asarray(blk2['tgt_emb'])},
    }


# ----------------------------- demo ------------------------------------------
if __name__ == "__main__":
    key = jax.random.PRNGKey(0)
    k_param, k_x, k_idx, k_delta, k_src, k_elem = jax.random.split(key, 6)

    params = init_params(k_param)

    num_edges = 12
    out_size = 6
    num_proj = 20

    x = jax.random.normal(k_x, (num_edges, IN_HIDDEN), jnp.float32)
    proj_index = jax.random.randint(k_idx, (4, num_proj), 0,
                                    out_size * LAT * LONG, jnp.int32)
    proj_delta = jax.random.uniform(k_delta, (4, num_proj), jnp.float32, 0.0, 1.0)
    proj_src_index = jax.random.randint(k_src, (num_proj,), 0, num_edges, jnp.int32)
    target_element = jax.random.randint(k_elem, (out_size,), 0, MAX_ELEM, jnp.int32)

    fwd = jax.jit(force_output_block, static_argnums=(2,))
    out = fwd(params, x, out_size, target_element,
              proj_index, proj_delta, proj_src_index)
    out = jax.block_until_ready(out)
    assert out.shape == (out_size, OUT_HIDDEN)
    assert jnp.all(jnp.isfinite(out))
    print("KERNEL_OK")
</pallas_src>

<mosaic_0001>
module attributes {stable_mosaic.version = 11 : i64} {
  func.func @force_output_kernel(%arg0: i32, %arg1: memref<16x1024xbf16, #tpu.memory_space<vmem>>, %arg2: memref<16x32xf32, #tpu.memory_space<vmem>>, %arg3: memref<1024x256xbf16, #tpu.memory_space<vmem>>, %arg4: memref<952x32xf32, #tpu.memory_space<vmem>>, %arg5: memref<96x256xf32, #tpu.memory_space<vmem>>, %arg6: memref<16x32xf32, #tpu.memory_space<vmem>>) attributes {dimension_semantics = [#tpu.dimension_semantics<parallel>], iteration_bounds = array<i64: 1>, scalar_prefetch = 0 : i64, scratch_operands = 0 : i64, tpu.core_type = #tpu.core_type<tc>, window_params = [{transform_indices = @transform_0, window_bounds = array<i64: 16, 1024>}, {transform_indices = @transform_1, window_bounds = array<i64: 16, 32>}, {pipeline_mode = #tpu.pipeline_mode<synchronous>, transform_indices = @transform_2, window_bounds = array<i64: 1024, 256>}, {pipeline_mode = #tpu.pipeline_mode<synchronous>, transform_indices = @transform_3, window_bounds = array<i64: 952, 32>}, {pipeline_mode = #tpu.pipeline_mode<synchronous>, transform_indices = @transform_4, window_bounds = array<i64: 96, 256>}, {transform_indices = @transform_5, window_bounds = array<i64: 16, 32>}]} {
    %c0 = arith.constant 0 : index
    %c0_0 = arith.constant 0 : index
    %0 = vector.load %arg1[%c0, %c0_0] : memref<16x1024xbf16, #tpu.memory_space<vmem>>, vector<16x1024xbf16>
    %c0_1 = arith.constant 0 : index
    %c0_2 = arith.constant 0 : index
    %1 = vector.load %arg3[%c0_1, %c0_2] : memref<1024x256xbf16, #tpu.memory_space<vmem>>, vector<1024x256xbf16>
    %cst = arith.constant dense<0.000000e+00> : vector<16x256xf32>
    %2 = tpu.matmul %0, %1, %cst {dimension_numbers = #tpu.dot_dimension_numbers<[1], [0], [0], [1], [0, 0, 1, 1], [], []>} : vector<16x1024xbf16>, vector<1024x256xbf16>, vector<16x256xf32> -> vector<16x256xf32>
    %c0_3 = arith.constant 0 : index
    %c0_4 = arith.constant 0 : index
    %3 = vector.load %arg5[%c0_3, %c0_4] : memref<96x256xf32, #tpu.memory_space<vmem>>, vector<1x256xf32>
    %4 = vector.broadcast %3 : vector<1x256xf32> to vector<16x256xf32>
    %5 = arith.addf %2, %4 : vector<16x256xf32>
    %6 = arith.negf %5 : vector<16x256xf32>
    %7 = math.exp %6 : vector<16x256xf32>
    %cst_5 = arith.constant 1.000000e+00 : f32
    %8 = vector.broadcast %cst_5 : f32 to vector<16x256xf32>
    %9 = arith.addf %8, %7 : vector<16x256xf32>
    %10 = arith.divf %8, %9 : vector<16x256xf32>
    %11 = arith.mulf %5, %10 : vector<16x256xf32>
    %c0_6 = arith.constant 0 : index
    %c0_7 = arith.constant 0 : index
    %12 = vector.load %arg4[%c0_6, %c0_7] : memref<952x32xf32, #tpu.memory_space<vmem>>, vector<256x32xf32>
    %cst_8 = arith.constant dense<0.000000e+00> : vector<16x32xf32>
    %13 = tpu.matmul %11, %12, %cst_8 {dimension_numbers = #tpu.dot_dimension_numbers<[1], [0], [0], [1], [0, 0, 1, 1], [], []>} : vector<16x256xf32>, vector<256x32xf32>, vector<16x32xf32> -> vector<16x32xf32>
    %c256 = arith.constant 256 : index
    %c0_9 = arith.constant 0 : index
    %14 = vector.load %arg4[%c256, %c0_9] : memref<952x32xf32, #tpu.memory_space<vmem>>, vector<32x32xf32>
    %cst_10 = arith.constant dense<0.000000e+00> : vector<16x32xf32>
    %15 = tpu.matmul %13, %14, %cst_10 {dimension_numbers = #tpu.dot_dimension_numbers<[1], [0], [0], [1], [0, 0, 1, 1], [], []>} : vector<16x32xf32>, vector<32x32xf32>, vector<16x32xf32> -> vector<16x32xf32>
    %16 = arith.mulf %13, %13 : vector<16x32xf32>
    %cst_11 = arith.constant dense<0.000000e+00> : vector<16x32xf32>
    %17 = tpu.matmul %16, %14, %cst_11 {dimension_numbers = #tpu.dot_dimension_numbers<[1], [0], [0], [1], [0, 0, 1, 1], [], []>} : vector<16x32xf32>, vector<32x32xf32>, vector<16x32xf32> -> vector<16x32xf32>
    %18 = arith.mulf %15, %15 : vector<16x32xf32>
    %19 = arith.subf %17, %18 : vector<16x32xf32>
    %20 = arith.subf %13, %15 : vector<16x32xf32>
    %cst_12 = arith.constant 9.99999974E-6 : f32
    %21 = vector.broadcast %cst_12 : f32 to vector<16x32xf32>
    %22 = arith.addf %19, %21 : vector<16x32xf32>
    %23 = math.rsqrt %22 : vector<16x32xf32>
    %24 = arith.mulf %20, %23 : vector<16x32xf32>
    %c288 = arith.constant 288 : index
    %c0_13 = arith.constant 0 : index
    %25 = vector.load %arg4[%c288, %c0_13] : memref<952x32xf32, #tpu.memory_space<vmem>>, vector<1x32xf32>
    %26 = vector.broadcast %25 : vector<1x32xf32> to vector<16x32xf32>
    %27 = arith.mulf %24, %26 : vector<16x32xf32>
    %c296 = arith.constant 296 : index
    %c0_14 = arith.constant 0 : index
    %28 = vector.load %arg4[%c296, %c0_14] : memref<952x32xf32, #tpu.memory_space<vmem>>, vector<1x32xf32>
    %29 = vector.broadcast %28 : vector<1x32xf32> to vector<16x32xf32>
    %30 = arith.addf %27, %29 : vector<16x32xf32>
    %c0_15 = arith.constant 0 : index
    %c0_16 = arith.constant 0 : index
    %31 = vector.load %arg2[%c0_15, %c0_16] : memref<16x32xf32, #tpu.memory_space<vmem>>, vector<16x32xf32>
    %c304 = arith.constant 304 : index
    %c0_17 = arith.constant 0 : index
    %32 = vector.load %arg4[%c304, %c0_17] : memref<952x32xf32, #tpu.memory_space<vmem>>, vector<32x32xf32>
    %cst_18 = arith.constant dense<0.000000e+00> : vector<16x32xf32>
    %33 = tpu.matmul %31, %32, %cst_18 {dimension_numbers = #tpu.dot_dimension_numbers<[1], [0], [0], [1], [0, 0, 1, 1], [], []>} : vector<16x32xf32>, vector<32x32xf32>, vector<16x32xf32> -> vector<16x32xf32>
    %c336 = arith.constant 336 : index
    %c0_19 = arith.constant 0 : index
    %34 = vector.load %arg4[%c336, %c0_19] : memref<952x32xf32, #tpu.memory_space<vmem>>, vector<1x32xf32>
    %35 = vector.broadcast %34 : vector<1x32xf32> to vector<16x32xf32>
    %36 = arith.addf %33, %35 : vector<16x32xf32>
    %c8 = arith.constant 8 : index
    %c0_20 = arith.constant 0 : index
    %37 = vector.load %arg5[%c8, %c0_20] : memref<96x256xf32, #tpu.memory_space<vmem>>, vector<8x256xf32>
    %38 = vector.extract_strided_slice %36 {offsets = [0, 0], sizes = [16, 8], strides = [1, 1]} : vector<16x32xf32> to vector<16x8xf32>
    %c344 = arith.constant 344 : index
    %c0_21 = arith.constant 0 : index
    %39 = vector.load %arg4[%c344, %c0_21] : memref<952x32xf32, #tpu.memory_space<vmem>>, vector<32x32xf32>
    %c376 = arith.constant 376 : index
    %c0_22 = arith.constant 0 : index
    %40 = vector.load %arg4[%c376, %c0_22] : memref<952x32xf32, #tpu.memory_space<vmem>>, vector<1x32xf32>
    %c16 = arith.constant 16 : index
    %c0_23 = arith.constant 0 : index
    %41 = vector.load %arg5[%c16, %c0_23] : memref<96x256xf32, #tpu.memory_space<vmem>>, vector<32x256xf32>
    %c48 = arith.constant 48 : index
    %c0_24 = arith.constant 0 : index
    %42 = vector.load %arg5[%c48, %c0_24] : memref<96x256xf32, #tpu.memory_space<vmem>>, vector<1x256xf32>
    %c384 = arith.constant 384 : index
    %c0_25 = arith.constant 0 : index
    %43 = vector.load %arg4[%c384, %c0_25] : memref<952x32xf32, #tpu.memory_space<vmem>>, vector<256x32xf32>
    %c640 = arith.constant 640 : index
    %c0_26 = arith.constant 0 : index
    %44 = vector.load %arg4[%c640, %c0_26] : memref<952x32xf32, #tpu.memory_space<vmem>>, vector<1x32xf32>
    %cst_27 = arith.constant dense<0xFF800000> : vector<16xf32>
    %45 = vector.multi_reduction <maximumf>, %38, %cst_27 [1] : vector<16x8xf32> to vector<16xf32>
    %46 = vector.shape_cast %45 : vector<16xf32> to vector<16x1xf32>
    %47 = vector.broadcast %46 : vector<16x1xf32> to vector<16x8xf32>
    %48 = arith.subf %38, %47 : vector<16x8xf32>
    %49 = math.exp %48 : vector<16x8xf32>
    %cst_28 = arith.constant dense<0.000000e+00> : vector<16xf32>
    %50 = vector.multi_reduction <add>, %49, %cst_28 [1] : vector<16x8xf32> to vector<16xf32>
    %51 = vector.shape_cast %50 : vector<16xf32> to vector<16x1xf32>
    %52 = tpu.reciprocal %51 {approx = true} : vector<16x1xf32> -> vector<16x1xf32>
    %53 = vector.broadcast %52 : vector<16x1xf32> to vector<16x8xf32>
    %54 = arith.mulf %49, %53 : vector<16x8xf32>
    %cst_29 = arith.constant dense<0.000000e+00> : vector<16x32xf32>
    %55 = tpu.matmul %30, %39, %cst_29 {dimension_numbers = #tpu.dot_dimension_numbers<[1], [0], [0], [1], [0, 0, 1, 1], [], []>} : vector<16x32xf32>, vector<32x32xf32>, vector<16x32xf32> -> vector<16x32xf32>
    %56 = vector.broadcast %40 : vector<1x32xf32> to vector<16x32xf32>
    %57 = arith.addf %55, %56 : vector<16x32xf32>
    %58 = arith.negf %57 : vector<16x32xf32>
    %59 = math.exp %58 : vector<16x32xf32>
    %cst_30 = arith.constant 1.000000e+00 : f32
    %60 = vector.broadcast %cst_30 : f32 to vector<16x32xf32>
    %61 = arith.addf %60, %59 : vector<16x32xf32>
    %62 = arith.divf %60, %61 : vector<16x32xf32>
    %63 = arith.mulf %57, %62 : vector<16x32xf32>
    %cst_31 = arith.constant dense<0.000000e+00> : vector<16x256xf32>
    %64 = tpu.matmul %63, %41, %cst_31 {dimension_numbers = #tpu.dot_dimension_numbers<[1], [0], [0], [1], [0, 0, 1, 1], [], []>} : vector<16x32xf32>, vector<32x256xf32>, vector<16x256xf32> -> vector<16x256xf32>
    %65 = vector.broadcast %42 : vector<1x256xf32> to vector<16x256xf32>
    %66 = arith.addf %64, %65 : vector<16x256xf32>
    %67 = arith.negf %66 : vector<16x256xf32>
    %68 = math.exp %67 : vector<16x256xf32>
    %cst_32 = arith.constant 1.000000e+00 : f32
    %69 = vector.broadcast %cst_32 : f32 to vector<16x256xf32>
    %70 = arith.addf %69, %68 : vector<16x256xf32>
    %71 = arith.divf %69, %70 : vector<16x256xf32>
    %72 = arith.mulf %66, %71 : vector<16x256xf32>
    %cst_33 = arith.constant dense<0.000000e+00> : vector<16x256xf32>
    %73 = tpu.matmul %54, %37, %cst_33 {dimension_numbers = #tpu.dot_dimension_numbers<[1], [0], [0], [1], [0, 0, 1, 1], [], []>} : vector<16x8xf32>, vector<8x256xf32>, vector<16x256xf32> -> vector<16x256xf32>
    %74 = arith.mulf %72, %73 : vector<16x256xf32>
    %cst_34 = arith.constant dense<0.000000e+00> : vector<16x32xf32>
    %75 = tpu.matmul %74, %43, %cst_34 {dimension_numbers = #tpu.dot_dimension_numbers<[1], [0], [0], [1], [0, 0, 1, 1], [], []>} : vector<16x256xf32>, vector<256x32xf32>, vector<16x32xf32> -> vector<16x32xf32>
    %76 = vector.broadcast %44 : vector<1x32xf32> to vector<16x32xf32>
    %77 = arith.addf %75, %76 : vector<16x32xf32>
    %78 = arith.negf %77 : vector<16x32xf32>
    %79 = math.exp %78 : vector<16x32xf32>
    %cst_35 = arith.constant 1.000000e+00 : f32
    %80 = vector.broadcast %cst_35 : f32 to vector<16x32xf32>
    %81 = arith.addf %80, %79 : vector<16x32xf32>
    %82 = arith.divf %80, %81 : vector<16x32xf32>
    %83 = arith.mulf %77, %82 : vector<16x32xf32>
    %84 = vector.extract_strided_slice %36 {offsets = [0, 8], sizes = [16, 8], strides = [1, 1]} : vector<16x32xf32> to vector<16x8xf32>
    %c648 = arith.constant 648 : index
    %c0_36 = arith.constant 0 : index
    %85 = vector.load %arg4[%c648, %c0_36] : memref<952x32xf32, #tpu.memory_space<vmem>>, vector<32x32xf32>
    %c680 = arith.constant 680 : index
    %c0_37 = arith.constant 0 : index
    %86 = vector.load %arg4[%c680, %c0_37] : memref<952x32xf32, #tpu.memory_space<vmem>>, vector<1x32xf32>
    %c56 = arith.constant 56 : index
    %c0_38 = arith.constant 0 : index
    %87 = vector.load %arg5[%c56, %c0_38] : memref<96x256xf32, #tpu.memory_space<vmem>>, vector<32x256xf32>
    %c88 = arith.constant 88 : index
    %c0_39 = arith.constant 0 : index
    %88 = vector.load %arg5[%c88, %c0_39] : memref<96x256xf32, #tpu.memory_space<vmem>>, vector<1x256xf32>
    %c688 = arith.constant 688 : index
    %c0_40 = arith.constant 0 : index
    %89 = vector.load %arg4[%c688, %c0_40] : memref<952x32xf32, #tpu.memory_space<vmem>>, vector<256x32xf32>
    %c944 = arith.constant 944 : index
    %c0_41 = arith.constant 0 : index
    %90 = vector.load %arg4[%c944, %c0_41] : memref<952x32xf32, #tpu.memory_space<vmem>>, vector<1x32xf32>
    %cst_42 = arith.constant dense<0xFF800000> : vector<16xf32>
    %91 = vector.multi_reduction <maximumf>, %84, %cst_42 [1] : vector<16x8xf32> to vector<16xf32>
    %92 = vector.shape_cast %91 : vector<16xf32> to vector<16x1xf32>
    %93 = vector.broadcast %92 : vector<16x1xf32> to vector<16x8xf32>
    %94 = arith.subf %84, %93 : vector<16x8xf32>
    %95 = math.exp %94 : vector<16x8xf32>
    %cst_43 = arith.constant dense<0.000000e+00> : vector<16xf32>
    %96 = vector.multi_reduction <add>, %95, %cst_43 [1] : vector<16x8xf32> to vector<16xf32>
    %97 = vector.shape_cast %96 : vector<16xf32> to vector<16x1xf32>
    %98 = tpu.reciprocal %97 {approx = true} : vector<16x1xf32> -> vector<16x1xf32>
    %99 = vector.broadcast %98 : vector<16x1xf32> to vector<16x8xf32>
    %100 = arith.mulf %95, %99 : vector<16x8xf32>
    %cst_44 = arith.constant dense<0.000000e+00> : vector<16x32xf32>
    %101 = tpu.matmul %83, %85, %cst_44 {dimension_numbers = #tpu.dot_dimension_numbers<[1], [0], [0], [1], [0, 0, 1, 1], [], []>} : vector<16x32xf32>, vector<32x32xf32>, vector<16x32xf32> -> vector<16x32xf32>
    %102 = vector.broadcast %86 : vector<1x32xf32> to vector<16x32xf32>
    %103 = arith.addf %101, %102 : vector<16x32xf32>
    %104 = arith.negf %103 : vector<16x32xf32>
    %105 = math.exp %104 : vector<16x32xf32>
    %cst_45 = arith.constant 1.000000e+00 : f32
    %106 = vector.broadcast %cst_45 : f32 to vector<16x32xf32>
    %107 = arith.addf %106, %105 : vector<16x32xf32>
    %108 = arith.divf %106, %107 : vector<16x32xf32>
    %109 = arith.mulf %103, %108 : vector<16x32xf32>
    %cst_46 = arith.constant dense<0.000000e+00> : vector<16x256xf32>
    %110 = tpu.matmul %109, %87, %cst_46 {dimension_numbers = #tpu.dot_dimension_numbers<[1], [0], [0], [1], [0, 0, 1, 1], [], []>} : vector<16x32xf32>, vector<32x256xf32>, vector<16x256xf32> -> vector<16x256xf32>
    %111 = vector.broadcast %88 : vector<1x256xf32> to vector<16x256xf32>
    %112 = arith.addf %110, %111 : vector<16x256xf32>
    %113 = arith.negf %112 : vector<16x256xf32>
    %114 = math.exp %113 : vector<16x256xf32>
    %cst_47 = arith.constant 1.000000e+00 : f32
    %115 = vector.broadcast %cst_47 : f32 to vector<16x256xf32>
    %116 = arith.addf %115, %114 : vector<16x256xf32>
    %117 = arith.divf %115, %116 : vector<16x256xf32>
    %118 = arith.mulf %112, %117 : vector<16x256xf32>
    %cst_48 = arith.constant dense<0.000000e+00> : vector<16x256xf32>
    %119 = tpu.matmul %100, %37, %cst_48 {dimension_numbers = #tpu.dot_dimension_numbers<[1], [0], [0], [1], [0, 0, 1, 1], [], []>} : vector<16x8xf32>, vector<8x256xf32>, vector<16x256xf32> -> vector<16x256xf32>
    %120 = arith.mulf %118, %119 : vector<16x256xf32>
    %cst_49 = arith.constant dense<0.000000e+00> : vector<16x32xf32>
    %121 = tpu.matmul %120, %89, %cst_49 {dimension_numbers = #tpu.dot_dimension_numbers<[1], [0], [0], [1], [0, 0, 1, 1], [], []>} : vector<16x256xf32>, vector<256x32xf32>, vector<16x32xf32> -> vector<16x32xf32>
    %122 = vector.broadcast %90 : vector<1x32xf32> to vector<16x32xf32>
    %123 = arith.addf %121, %122 : vector<16x32xf32>
    %c0_50 = arith.constant 0 : index
    %c0_51 = arith.constant 0 : index
    %124 = vector.load %arg6[%c0_50, %c0_51] : memref<16x32xf32, #tpu.memory_space<vmem>>, vector<16x32xf32>
    tpu.vector_store %arg6[%c0_50, %c0_51], %123 {strides = array<i32>} : memref<16x32xf32, #tpu.memory_space<vmem>>, vector<16x32xf32>,
    return
  }
  func.func @transform_0(%arg0: i32) -> (i32, i32) {
    %c0_i32 = arith.constant 0 : i32
    %c0_i32_0 = arith.constant 0 : i32
    return %arg0, %c0_i32 : i32, i32
  }
  func.func @transform_1(%arg0: i32) -> (i32, i32) {
    %c0_i32 = arith.constant 0 : i32
    %c0_i32_0 = arith.constant 0 : i32
    return %arg0, %c0_i32 : i32, i32
  }
  func.func @transform_2(%arg0: i32) -> (i32, i32) {
    %c0_i32 = arith.constant 0 : i32
    %c0_i32_0 = arith.constant 0 : i32
    %c0_i32_1 = arith.constant 0 : i32
    return %c0_i32, %c0_i32_0 : i32, i32
  }
  func.func @transform_3(%arg0: i32) -> (i32, i32) {
    %c0_i32 = arith.constant 0 : i32
    %c0_i32_0 = arith.constant 0 : i32
    %c0_i32_1 = arith.constant 0 : i32
    return %c0_i32, %c0_i32_0 : i32, i32
  }
  func.func @transform_4(%arg0: i32) -> (i32, i32) {
    %c0_i32 = arith.constant 0 : i32
    %c0_i32_0 = arith.constant 0 : i32
    %c0_i32_1 = arith.constant 0 : i32
    return %c0_i32, %c0_i32_0 : i32, i32
  }
  func.func @transform_5(%arg0: i32) -> (i32, i32) {
    %c0_i32 = arith.constant 0 : i32
    %c0_i32_0 = arith.constant 0 : i32
    return %arg0, %c0_i32 : i32, i32
  }
}

</mosaic_0001>

<bundles_post_ra>
// kernel: force_output_block.1
= control target key start
LH: loop header
LB: loop body
LE: loop exit
PB: predicated region body
PF: predicated region fallthrough
CT: control target
= control target key end

     0   :  { %s3016_s19 = smov 120   ;;  %s4461_s2 = inlined_call_operand.vmem [shape: bf16[1024,256], index: 2, kind: input, shape index: {}]   ;;  %s4462_s0 = inlined_call_operand.vmem [shape: bf16[16,1024], index: 0, kind: input, shape index: {}]   ;;  %s4463_s3 = inlined_call_operand.vmem [shape: f32[952,32], index: 3, kind: input, shape index: {}]   ;;  %s4464_s4 = inlined_call_operand.vmem [shape: f32[96,256], index: 4, kind: input, shape index: {}]   ;;  %s4465_s1 = inlined_call_operand.vmem [shape: f32[16,32], index: 1, kind: input, shape index: {}]   ;;  %s4466_s5 = inlined_call_operand.vmem [shape: f32[16,32], index: 5, kind: output, shape index: {}]  }
   0x1   :  { %v2276_v0 = vld [vmem:[%s4461_s2 + $0x70] sm:$0xf]  ;;  %v2799_v1 = vld [vmem:[%s4461_s2 + $0x74] sm:$0xf0]  ;;  %v2268_v11 = vld [vmem:[%s4461_s2 + $0x60] sm:$0xf] }
   0x2   :  { %v2340_v2 = vld [vmem:[%s4461_s2 + $0xf0] sm:$0xf]  ;;  %v2277_v3 = vor.u32 %v2799_v1, %v2276_v0  ;;  %v2815_v4 = vld [vmem:[%s4461_s2 + $0xf4] sm:$0xf0]  ;;  %v2797_v13 = vld [vmem:[%s4461_s2 + $0x64] sm:$0xf0] }
   0x3   :  { %v2404_v5 = vld [vmem:[%s4461_s2 + $0x170] sm:$0xf]  ;;  %v2831_v6 = vld [vmem:[%s4461_s2 + $0x174] sm:$0xf0]  ;;  %v2341_v7 = vor.u32 %v2815_v4, %v2340_v2  ;;  %v2332_v14 = vld [vmem:[%s4461_s2 + $0xe0] sm:$0xf]  ;;  %v2269_v16 = vor.u32 %v2797_v13, %v2268_v11 }
   0x4   :  { %v2405_v8 = vor.u32 %v2831_v6, %v2404_v5  ;;  %v2468_v9 = vld [vmem:[%s4461_s2 + $0x1f0] sm:$0xf]  ;;  %v2847_v10 = vld [vmem:[%s4461_s2 + $0x1f4] sm:$0xf0]  ;;  %842 = vmatpush.bf16.msra.mxu0 %v2277_v3  ;;  %v2813_v15 = vld [vmem:[%s4461_s2 + $0xe4] sm:$0xf0] }
   0x5   :  { %v2469_v12 = vor.u32 %v2847_v10, %v2468_v9  ;;  %856 = vmatpush.bf16.msra.mxu1 %v2341_v7  ;;  %v2333_v17 = vor.u32 %v2813_v15, %v2332_v14  ;;  %v2396_v18 = vld [vmem:[%s4461_s2 + $0x160] sm:$0xf]  ;;  %v2829_v19 = vld [vmem:[%s4461_s2 + $0x164] sm:$0xf0]  ;;  %v2260_v23 = vld [vmem:[%s4461_s2 + $0x50] sm:$0xf] }
   0x6   :  { %870 = vmatpush.bf16.msra.mxu2 %v2405_v8  ;;  %v2460_v20 = vld [vmem:[%s4461_s2 + $0x1e0] sm:$0xf]  ;;  %v2397_v21 = vor.u32 %v2829_v19, %v2396_v18  ;;  %v2845_v22 = vld [vmem:[%s4461_s2 + $0x1e4] sm:$0xf0]  ;;  %v2795_v24 = vld [vmem:[%s4461_s2 + $0x54] sm:$0xf0] }
   0x7   :  { %884 = vmatpush.bf16.msra.mxu3 %v2469_v12  ;;  %v2461_v25 = vor.u32 %v2845_v22, %v2460_v20  ;;  %v2324_v26 = vld [vmem:[%s4461_s2 + $0xd0] sm:$0xf]  ;;  %v2811_v27 = vld [vmem:[%s4461_s2 + $0xd4] sm:$0xf0]  ;;  %v2261_v29 = vor.u32 %v2795_v24, %v2260_v23  ;;  %v2252_v35 = vld [vmem:[%s4461_s2 + $0x40] sm:$0xf] }
   0x8   :  { %v2388_v28 = vld [vmem:[%s4461_s2 + $0x150] sm:$0xf]  ;;  %843 = vmatpush.bf16.msra.mxu0 %v2269_v16  ;;  %v2827_v30 = vld [vmem:[%s4461_s2 + $0x154] sm:$0xf0]  ;;  %v2325_v33 = vor.u32 %v2811_v27, %v2324_v26  ;;  %v2793_v36 = vld [vmem:[%s4461_s2 + $0x44] sm:$0xf0] }
   0x9   :  { %v2452_v31 = vld [vmem:[%s4461_s2 + $0x1d0] sm:$0xf]  ;;  %v2843_v32 = vld [vmem:[%s4461_s2 + $0x1d4] sm:$0xf0]  ;;  %857 = vmatpush.bf16.msra.mxu1 %v2333_v17  ;;  %v2389_v34 = vor.u32 %v2827_v30, %v2388_v28  ;;  %v2316_v37 = vld [vmem:[%s4461_s2 + $0xc0] sm:$0xf]  ;;  %v2253_v44 = vor.u32 %v2793_v36, %v2252_v35 }
   0xa   :  { %871 = vmatpush.bf16.msra.mxu2 %v2397_v21  ;;  %v2453_v38 = vor.u32 %v2843_v32, %v2452_v31  ;;  %v2809_v39 = vld [vmem:[%s4461_s2 + $0xc4] sm:$0xf0]  ;;  %v2380_v40 = vld [vmem:[%s4461_s2 + $0x140] sm:$0xf]  ;;  %v2244_v47 = vld [vmem:[%s4461_s2 + $0x30] sm:$0xf] }
   0xb   :  { %885 = vmatpush.bf16.msra.mxu3 %v2461_v25  ;;  %v2825_v41 = vld [vmem:[%s4461_s2 + $0x144] sm:$0xf0]  ;;  %v2444_v42 = vld [vmem:[%s4461_s2 + $0x1c0] sm:$0xf]  ;;  %v2317_v45 = vor.u32 %v2809_v39, %v2316_v37  ;;  %v2791_v48 = vld [vmem:[%s4461_s2 + $0x34] sm:$0xf0] }
   0xc   :  { %v2841_v43 = vld [vmem:[%s4461_s2 + $0x1c4] sm:$0xf0]  ;;  %844 = vmatpush.bf16.msra.mxu0 %v2261_v29  ;;  %v2381_v46 = vor.u32 %v2825_v41, %v2380_v40  ;;  %v2308_v49 = vld [vmem:[%s4461_s2 + $0xb0] sm:$0xf]  ;;  %v2807_v51 = vld [vmem:[%s4461_s2 + $0xb4] sm:$0xf0]  ;;  %v2245_v56 = vor.u32 %v2791_v48, %v2244_v47 }
   0xd   :  { %858 = vmatpush.bf16.msra.mxu1 %v2325_v33  ;;  %v2445_v50 = vor.u32 %v2841_v43, %v2444_v42  ;;  %v2372_v52 = vld [vmem:[%s4461_s2 + $0x130] sm:$0xf]  ;;  %v2823_v53 = vld [vmem:[%s4461_s2 + $0x134] sm:$0xf0]  ;;  %v2309_v57 = vor.u32 %v2807_v51, %v2308_v49  ;;  %v2236_v59 = vld [vmem:[%s4461_s2 + $0x20] sm:$0xf] }
   0xe   :  { %872 = vmatpush.bf16.msra.mxu2 %v2389_v34  ;;  %v2436_v54 = vld [vmem:[%s4461_s2 + $0x1b0] sm:$0xf]  ;;  %v2839_v55 = vld [vmem:[%s4461_s2 + $0x1b4] sm:$0xf0]  ;;  %v2373_v58 = vor.u32 %v2823_v53, %v2372_v52  ;;  %v2789_v60 = vld [vmem:[%s4461_s2 + $0x24] sm:$0xf0] }
   0xf   :  { %886 = vmatpush.bf16.msra.mxu3 %v2453_v38  ;;  %v2300_v61 = vld [vmem:[%s4461_s2 + $0xa0] sm:$0xf]  ;;  %v2437_v62 = vor.u32 %v2839_v55, %v2436_v54  ;;  %v2805_v63 = vld [vmem:[%s4461_s2 + $0xa4] sm:$0xf0]  ;;  %v2237_v4 = vor.u32 %v2789_v60, %v2236_v59  ;;  %v2228_v7 = vld [vmem:[%s4461_s2 + $0x10] sm:$0xf] }
  0x10   :  { %845 = vmatpush.bf16.msra.mxu0 %v2253_v44  ;;  %v2364_v0 = vld [vmem:[%s4461_s2 + $0x120] sm:$0xf]  ;;  %v2821_v1 = vld [vmem:[%s4461_s2 + $0x124] sm:$0xf0]  ;;  %v2301_v5 = vor.u32 %v2805_v63, %v2300_v61  ;;  %v2787_v8 = vld [vmem:[%s4461_s2 + $0x14] sm:$0xf0] }
  0x11   :  { %859 = vmatpush.bf16.msra.mxu1 %v2317_v45  ;;  %v2428_v2 = vld [vmem:[%s4461_s2 + $0x1a0] sm:$0xf]  ;;  %v2837_v3 = vld [vmem:[%s4461_s2 + $0x1a4] sm:$0xf0]  ;;  %v2365_v6 = vor.u32 %v2821_v1, %v2364_v0  ;;  %v2292_v9 = vld [vmem:[%s4461_s2 + $0x90] sm:$0xf]  ;;  %v2229_v16 = vor.u32 %v2787_v8, %v2228_v7 }
  0x12   :  { %873 = vmatpush.bf16.msra.mxu2 %v2381_v46  ;;  %v2429_v10 = vor.u32 %v2837_v3, %v2428_v2  ;;  %v2803_v11 = vld [vmem:[%s4461_s2 + $0x94] sm:$0xf0]  ;;  %v2356_v12 = vld [vmem:[%s4461_s2 + $0x110] sm:$0xf]  ;;  %v2220_v17 = vld [vmem:[%s4461_s2] sm:$0xf] }
  0x13   :  { %887 = vmatpush.bf16.msra.mxu3 %v2445_v50  ;;  %v2819_v13 = vld [vmem:[%s4461_s2 + $0x114] sm:$0xf0]  ;;  %v2420_v14 = vld [vmem:[%s4461_s2 + $0x190] sm:$0xf]  ;;  %v2785_v18 = vld [vmem:[%s4461_s2 + $0x4] sm:$0xf0]  ;;  %v2293_v19 = vor.u32 %v2803_v11, %v2292_v9 }
  0x14   :  { %846 = vmatpush.bf16.msra.mxu0 %v2245_v56  ;;  %v2835_v15 = vld [vmem:[%s4461_s2 + $0x194] sm:$0xf0]  ;;  %v2357_v20 = vor.u32 %v2819_v13, %v2356_v12  ;;  %v2284_v21 = vld [vmem:[%s4461_s2 + $0x80] sm:$0xf]  ;;  %v2801_v22 = vld [vmem:[%s4461_s2 + $0x84] sm:$0xf0]  ;;  %v2221_v31 = vor.u32 %v2785_v18, %v2220_v17 }
  0x15   :  { %860 = vmatpush.bf16.msra.mxu1 %v2309_v57  ;;  %v2348_v23 = vld [vmem:[%s4461_s2 + $0x100] sm:$0xf]  ;;  %v2421_v24 = vor.u32 %v2835_v15, %v2420_v14  ;;  %v2817_v25 = vld [vmem:[%s4461_s2 + $0x104] sm:$0xf0]  ;;  %v2532_v28 = vld [vmem:[%s4461_s2 + $0x270] sm:$0xf]  ;;  %v2285_v35 = vor.u32 %v2801_v22, %v2284_v21 }
  0x16   :  { %874 = vmatpush.bf16.msra.mxu2 %v2373_v58  ;;  %v2412_v26 = vld [vmem:[%s4461_s2 + $0x180] sm:$0xf]  ;;  %v2833_v27 = vld [vmem:[%s4461_s2 + $0x184] sm:$0xf0]  ;;  %v2863_v29 = vld [vmem:[%s4461_s2 + $0x274] sm:$0xf0]  ;;  %v2349_v36 = vor.u32 %v2817_v25, %v2348_v23 }
  0x17   :  { %888 = vmatpush.bf16.msra.mxu3 %v2437_v62  ;;  %v2596_v30 = vld [vmem:[%s4461_s2 + $0x2f0] sm:$0xf]  ;;  %v2879_v32 = vld [vmem:[%s4461_s2 + $0x2f4] sm:$0xf0]  ;;  %v2413_v39 = vor.u32 %v2833_v27, %v2412_v26  ;;  %v2533_v40 = vor.u32 %v2863_v29, %v2532_v28  ;;  %v2524_v41 = vld [vmem:[%s4461_s2 + $0x260] sm:$0xf] }
  0x18   :  { %847 = vmatpush.bf16.msra.mxu0 %v2237_v4  ;;  %v2660_v33 = vld [vmem:[%s4461_s2 + $0x370] sm:$0xf]  ;;  %v2895_v34 = vld [vmem:[%s4461_s2 + $0x374] sm:$0xf0]  ;;  %v2861_v42 = vld [vmem:[%s4461_s2 + $0x264] sm:$0xf0]  ;;  %v2597_v43 = vor.u32 %v2879_v32, %v2596_v30 }
  0x19   :  { %861 = vmatpush.bf16.msra.mxu1 %v2301_v5  ;;  %v2724_v37 = vld [vmem:[%s4461_s2 + $0x3f0] sm:$0xf]  ;;  %v2911_v38 = vld [vmem:[%s4461_s2 + $0x3f4] sm:$0xf0]  ;;  %v2661_v44 = vor.u32 %v2895_v34, %v2660_v33  ;;  %v2588_v45 = vld [vmem:[%s4461_s2 + $0x2e0] sm:$0xf]  ;;  %v2525_v55 = vor.u32 %v2861_v42, %v2524_v41 }
  0x1a   :  { %875 = vmatpush.bf16.msra.mxu2 %v2365_v6  ;;  %v2877_v46 = vld [vmem:[%s4461_s2 + $0x2e4] sm:$0xf0]  ;;  %v2652_v47 = vld [vmem:[%s4461_s2 + $0x360] sm:$0xf]  ;;  %v2725_v48 = vor.u32 %v2911_v38, %v2724_v37  ;;  %v2516_v56 = vld [vmem:[%s4461_s2 + $0x250] sm:$0xf] }
  0x1b   :  { %889 = vmatpush.bf16.msra.mxu3 %v2429_v10  ;;  %v2893_v49 = vld [vmem:[%s4461_s2 + $0x364] sm:$0xf0]  ;;  %v2716_v50 = vld [vmem:[%s4461_s2 + $0x3e0] sm:$0xf]  ;;  %v2859_v57 = vld [vmem:[%s4461_s2 + $0x254] sm:$0xf0]  ;;  %v2589_v60 = vor.u32 %v2877_v46, %v2588_v45 }
  0x1c   :  { %848 = vmatpush.bf16.msra.mxu0 %v2229_v16  ;;  %v2909_v51 = vld [vmem:[%s4461_s2 + $0x3e4] sm:$0xf0]  ;;  %v2188_v52 = vld [vmem:[%s4462_s0] sm:$0xf]  ;;  %v2653_v61 = vor.u32 %v2893_v49, %v2652_v47  ;;  %v2580_v62 = vld [vmem:[%s4461_s2 + $0x2d0] sm:$0xf]  ;;  %v2517_v9 = vor.u32 %v2859_v57, %v2516_v56 }
  0x1d   :  { %862 = vmatpush.bf16.msra.mxu1 %v2293_v19  ;;  %v2780_v53 = vld [vmem:[%s4462_s0 + $0x1c] sm:$0xf0]  ;;  %v2196_v54 = vld [vmem:[%s4462_s0 + $0x8] sm:$0xf]  ;;  %v2875_v63 = vld [vmem:[%s4461_s2 + $0x2d4] sm:$0xf0]  ;;  %v2717_v2 = vor.u32 %v2909_v51, %v2716_v50 }
  0x1e   :  { %876 = vmatpush.bf16.msra.mxu2 %v2357_v20  ;;  %v3302_v58 = vor.u32 %v2780_v53, %v2188_v52  ;;  %v2781_v59 = vld [vmem:[%s4462_s0 + $0x24] sm:$0xf0]  ;;  %v2644_v0 = vld [vmem:[%s4461_s2 + $0x350] sm:$0xf]  ;;  %v2891_v3 = vld [vmem:[%s4461_s2 + $0x354] sm:$0xf0]  ;;  %v2581_v12 = vor.u32 %v2875_v63, %v2580_v62 }
  0x1f   :  { %890 = vmatpush.bf16.msra.mxu3 %v2421_v24  ;;  %v3316_v1 = vor.u32 %v2781_v59, %v2196_v54  ;;  %v2708_v4 = vld [vmem:[%s4461_s2 + $0x3d0] sm:$0xf]  ;;  %v2907_v5 = vld [vmem:[%s4461_s2 + $0x3d4] sm:$0xf0]  ;;  %v2776_v6 = vld [vmem:[%s4462_s0 + $0x4] sm:$0xf]  ;;  %v2645_v13 = vor.u32 %v2891_v3, %v2644_v0 }
  0x20   :  { %849 = vmatpush.bf16.msra.mxu0 %v2221_v31  ;;  %v2190_v7 = vld [vmem:[%s4462_s0 + $0x20] sm:$0xf0]  ;;  %v2777_v8 = vld [vmem:[%s4462_s0 + $0xc] sm:$0xf]  ;;  %v2508_v14 = vld [vmem:[%s4461_s2 + $0x240] sm:$0xf]  ;;  %v2709_v18 = vor.u32 %v2907_v5, %v2708_v4 }
  0x21   :  { %863 = vmatpush.bf16.msra.mxu1 %v2285_v35  ;;  %v3338_v10 = vor.u32 %v2776_v6, %v2190_v7  ;;  %v2198_v11 = vld [vmem:[%s4462_s0 + $0x28] sm:$0xf0]  ;;  %v2857_v15 = vld [vmem:[%s4461_s2 + $0x244] sm:$0xf0]  ;;  %v2572_v16 = vld [vmem:[%s4461_s2 + $0x2c0] sm:$0xf] }
  0x22   :  { %877 = vmatpush.bf16.msra.mxu2 %v2349_v36  ;;  %v3352_v17 = vor.u32 %v2777_v8, %v2198_v11  ;;  %v2873_v19 = vld [vmem:[%s4461_s2 + $0x2c4] sm:$0xf0]  ;;  %v2636_v20 = vld [vmem:[%s4461_s2 + $0x340] sm:$0xf]  ;;  %v2509_v24 = vor.u32 %v2857_v15, %v2508_v14  ;;  %v2500_v27 = vld [vmem:[%s4461_s2 + $0x230] sm:$0xf] }
  0x23   :  { %891 = vmatpush.bf16.msra.mxu3 %v2413_v39  ;;  %850 = vmatmul.bf16.vlgmr.msra.gmra.mxu0 %v3302_v58  ;;  %v2889_v21 = vld [vmem:[%s4461_s2 + $0x344] sm:$0xf0]  ;;  %v2700_v22 = vld [vmem:[%s4461_s2 + $0x3c0] sm:$0xf]  ;;  %v2573_v25 = vor.u32 %v2873_v19, %v2572_v16  ;;  %v2855_v28 = vld [vmem:[%s4461_s2 + $0x234] sm:$0xf0] }
  0x24   :  { %898 = vmatpush.bf16.msrb.mxu0 %v2533_v40  ;;  %864 = vmatmul.bf16.vlgmr.msra.gmra.mxu1 %v3338_v10  ;;  %v2905_v23 = vld [vmem:[%s4461_s2 + $0x3c4] sm:$0xf0]  ;;  %v2637_v26 = vor.u32 %v2889_v21, %v2636_v20  ;;  %v2564_v29 = vld [vmem:[%s4461_s2 + $0x2b0] sm:$0xf]  ;;  %v2871_v31 = vld [vmem:[%s4461_s2 + $0x2b4] sm:$0xf0]  ;;  %v2501_v36 = vor.u32 %v2855_v28, %v2500_v27 }
  0x25   :  { %912 = vmatpush.bf16.msrb.mxu1 %v2597_v43  ;;  %878 = vmatmul.bf16.vlgmr.msra.gmra.mxu2 %v3316_v1  ;;  %v2701_v30 = vor.u32 %v2905_v23, %v2700_v22  ;;  %v2628_v32 = vld [vmem:[%s4461_s2 + $0x330] sm:$0xf]  ;;  %v2887_v33 = vld [vmem:[%s4461_s2 + $0x334] sm:$0xf0]  ;;  %v2565_v37 = vor.u32 %v2871_v31, %v2564_v29  ;;  %v2492_v39 = vld [vmem:[%s4461_s2 + $0x220] sm:$0xf] }
  0x26   :  { %926 = vmatpush.bf16.msrb.mxu2 %v2661_v44  ;;  %892 = vmatmul.bf16.vlgmr.msra.gmra.mxu3 %v3352_v17  ;;  %v2692_v34 = vld [vmem:[%s4461_s2 + $0x3b0] sm:$0xf]  ;;  %v2903_v35 = vld [vmem:[%s4461_s2 + $0x3b4] sm:$0xf0]  ;;  %v2629_v38 = vor.u32 %v2887_v33, %v2628_v32  ;;  %v2853_v40 = vld [vmem:[%s4461_s2 + $0x224] sm:$0xf0] }
  0x27   :  { %940 = vmatpush.bf16.msrb.mxu3 %v2725_v48  ;;  %v2556_v41 = vld [vmem:[%s4461_s2 + $0x2a0] sm:$0xf]  ;;  %v2693_v42 = vor.u32 %v2903_v35, %v2692_v34  ;;  %v2869_v43 = vld [vmem:[%s4461_s2 + $0x2a4] sm:$0xf0]  ;;  %v2493_v48 = vor.u32 %v2853_v40, %v2492_v39  ;;  %v2484_v49 = vld [vmem:[%s4461_s2 + $0x210] sm:$0xf] }
  0x28   :  { %899 = vmatpush.bf16.msrb.mxu0 %v2525_v55  ;;  %v2620_v44 = vld [vmem:[%s4461_s2 + $0x320] sm:$0xf]  ;;  %v2885_v45 = vld [vmem:[%s4461_s2 + $0x324] sm:$0xf0]  ;;  %v2557_v50 = vor.u32 %v2869_v43, %v2556_v41  ;;  %v2851_v52 = vld [vmem:[%s4461_s2 + $0x214] sm:$0xf0] }
  0x29   :  { %913 = vmatpush.bf16.msrb.mxu1 %v2589_v60  ;;  %v2684_v46 = vld [vmem:[%s4461_s2 + $0x3a0] sm:$0xf]  ;;  %v2901_v47 = vld [vmem:[%s4461_s2 + $0x3a4] sm:$0xf0]  ;;  %v2621_v51 = vor.u32 %v2885_v45, %v2620_v44  ;;  %v2548_v53 = vld [vmem:[%s4461_s2 + $0x290] sm:$0xf]  ;;  %v2485_v63 = vor.u32 %v2851_v52, %v2484_v49 }
  0x2a   :  { %927 = vmatpush.bf16.msrb.mxu2 %v2653_v61  ;;  %v2867_v54 = vld [vmem:[%s4461_s2 + $0x294] sm:$0xf0]  ;;  %v2685_v55 = vor.u32 %v2901_v47, %v2684_v46  ;;  %v2612_v56 = vld [vmem:[%s4461_s2 + $0x310] sm:$0xf]  ;;  %v2476_v61 = vld [vmem:[%s4461_s2 + $0x200] sm:$0xf] }
  0x2b   :  { %941 = vmatpush.bf16.msrb.mxu3 %v2717_v2  ;;  %v2883_v57 = vld [vmem:[%s4461_s2 + $0x314] sm:$0xf0]  ;;  %v2676_v59 = vld [vmem:[%s4461_s2 + $0x390] sm:$0xf]  ;;  %v2849_v62 = vld [vmem:[%s4461_s2 + $0x204] sm:$0xf0]  ;;  %v2549_v5 = vor.u32 %v2867_v54, %v2548_v53 }
  0x2c   :  { %900 = vmatpush.bf16.msrb.mxu0 %v2517_v9  ;;  %v2899_v60 = vld [vmem:[%s4461_s2 + $0x394] sm:$0xf0]  ;;  %v2540_v0 = vld [vmem:[%s4461_s2 + $0x280] sm:$0xf]  ;;  %v2865_v2 = vld [vmem:[%s4461_s2 + $0x284] sm:$0xf0]  ;;  %v2613_v6 = vor.u32 %v2883_v57, %v2612_v56  ;;  %v2477_v19 = vor.u32 %v2849_v62, %v2476_v61 }
  0x2d   :  { %914 = vmatpush.bf16.msrb.mxu1 %v2581_v12  ;;  %v2604_v3 = vld [vmem:[%s4461_s2 + $0x300] sm:$0xf]  ;;  %v2881_v4 = vld [vmem:[%s4461_s2 + $0x304] sm:$0xf0]  ;;  %v2798_v9 = vld [vmem:[%s4461_s2 + $0x74] sm:$0xf]  ;;  %v2677_v11 = vor.u32 %v2899_v60, %v2676_v59  ;;  %v2541_v23 = vor.u32 %v2865_v2, %v2540_v0 }
  0x2e   :  { %928 = vmatpush.bf16.msrb.mxu2 %v2645_v13  ;;  %v2668_v7 = vld [vmem:[%s4461_s2 + $0x380] sm:$0xf]  ;;  %v2897_v8 = vld [vmem:[%s4461_s2 + $0x384] sm:$0xf0]  ;;  %v2278_v12 = vld [vmem:[%s4461_s2 + $0x78] sm:$0xf0] }
  0x2f   :  { %942 = vmatpush.bf16.msrb.mxu3 %v2709_v18  ;;  %v2814_v13 = vld [vmem:[%s4461_s2 + $0xf4] sm:$0xf]  ;;  %v2342_v14 = vld [vmem:[%s4461_s2 + $0xf8] sm:$0xf0]  ;;  %v2204_v21 = vld [vmem:[%s4462_s0 + $0x10] sm:$0xf]  ;;  %v2669_v28 = vor.u32 %v2897_v8, %v2668_v7  ;;  %v2281_v29 = vor.u32 %v2798_v9, %v2278_v12 }
  0x30   :  { %901 = vmatpush.bf16.msrb.mxu0 %v2509_v24  ;;  %v2830_v15 = vld [vmem:[%s4461_s2 + $0x174] sm:$0xf]  ;;  %v2406_v16 = vld [vmem:[%s4461_s2 + $0x178] sm:$0xf0]  ;;  %v2782_v22 = vld [vmem:[%s4462_s0 + $0x2c] sm:$0xf0]  ;;  %v2605_v24 = vor.u32 %v2881_v4, %v2604_v3  ;;  %v2345_v33 = vor.u32 %v2814_v13, %v2342_v14 }
  0x31   :  { %915 = vmatpush.bf16.msrb.mxu1 %v2573_v25  ;;  %v2846_v18 = vld [vmem:[%s4461_s2 + $0x1f4] sm:$0xf]  ;;  %v2470_v20 = vld [vmem:[%s4461_s2 + $0x1f8] sm:$0xf0]  ;;  %v2212_v25 = vld [vmem:[%s4462_s0 + $0x18] sm:$0xf]  ;;  %v2409_v34 = vor.u32 %v2830_v15, %v2406_v16  ;;  %v3524_v39 = vor.u32 %v2782_v22, %v2204_v21 }
  0x32   :  { %929 = vmatpush.bf16.msrb.mxu2 %v2637_v26  ;;  %v2783_v26 = vld [vmem:[%s4462_s0 + $0x34] sm:$0xf0]  ;;  %v2778_v27 = vld [vmem:[%s4462_s0 + $0x14] sm:$0xf]  ;;  %v2779_v31 = vld [vmem:[%s4462_s0 + $0x1c] sm:$0xf] }
  0x33   :  { %943 = vmatpush.bf16.msrb.mxu3 %v2701_v30  ;;  %v2206_v30 = vld [vmem:[%s4462_s0 + $0x30] sm:$0xf0]  ;;  %v2214_v32 = vld [vmem:[%s4462_s0 + $0x38] sm:$0xf0]  ;;  %v2796_v35 = vld [vmem:[%s4461_s2 + $0x64] sm:$0xf]  ;;  %v3535_v43 = vor.u32 %v2783_v26, %v2212_v25 }
  0x34   :  { %902 = vmatpush.bf16.msrb.mxu0 %v2501_v36  ;;  %v2270_v36 = vld [vmem:[%s4461_s2 + $0x68] sm:$0xf0]  ;;  %v2828_v41 = vld [vmem:[%s4461_s2 + $0x164] sm:$0xf]  ;;  %v3537_v44 = vor.u32 %v2778_v27, %v2206_v30  ;;  %v3545_v47 = vor.u32 %v2779_v31, %v2214_v32  ;;  %v2262_v52 = vld [vmem:[%s4461_s2 + $0x58] sm:$0xf0] }
  0x35   :  { %916 = vmatpush.bf16.msrb.mxu1 %v2565_v37  ;;  %v2812_v37 = vld [vmem:[%s4461_s2 + $0xe4] sm:$0xf]  ;;  %v2334_v40 = vld [vmem:[%s4461_s2 + $0xe8] sm:$0xf0]  ;;  %v2810_v53 = vld [vmem:[%s4461_s2 + $0xd4] sm:$0xf] }
  0x36   :  { %930 = vmatpush.bf16.msrb.mxu2 %v2629_v38  ;;  %v2473_v38 = vor.u32 %v2846_v18, %v2470_v20  ;;  %v2844_v45 = vld [vmem:[%s4461_s2 + $0x1e4] sm:$0xf]  ;;  %v2462_v46 = vld [vmem:[%s4461_s2 + $0x1e8] sm:$0xf0]  ;;  %v2337_v49 = vor.u32 %v2812_v37, %v2334_v40  ;;  %v2826_v56 = vld [vmem:[%s4461_s2 + $0x154] sm:$0xf] }
  0x37   :  { %944 = vmatpush.bf16.msrb.mxu3 %v2693_v42  ;;  %v2398_v42 = vld [vmem:[%s4461_s2 + $0x168] sm:$0xf0]  ;;  %v2465_v54 = vor.u32 %v2844_v45, %v2462_v46  ;;  %v2390_v57 = vld [vmem:[%s4461_s2 + $0x158] sm:$0xf0]  ;;  %v2842_v59 = vld [vmem:[%s4461_s2 + $0x1d4] sm:$0xf] }
  0x38   :  { %903 = vmatpush.bf16.msrb.mxu0 %v2493_v48  ;;  %v2273_v48 = vor.u32 %v2796_v35, %v2270_v36  ;;  %v2454_v60 = vld [vmem:[%s4461_s2 + $0x1d8] sm:$0xf0]  ;;  %v2792_v0 = vld [vmem:[%s4461_s2 + $0x44] sm:$0xf]  ;;  %v2254_v2 = vld [vmem:[%s4461_s2 + $0x48] sm:$0xf0] }
  0x39   :  { %917 = vmatpush.bf16.msrb.mxu1 %v2557_v50  ;;  %v2401_v50 = vor.u32 %v2828_v41, %v2398_v42  ;;  %v2808_v3 = vld [vmem:[%s4461_s2 + $0xc4] sm:$0xf]  ;;  %v2457_v4 = vor.u32 %v2842_v59, %v2454_v60  ;;  %v2382_v7 = vld [vmem:[%s4461_s2 + $0x148] sm:$0xf0]  ;;  %v2790_v14 = vld [vmem:[%s4461_s2 + $0x34] sm:$0xf] }
  0x3a   :  { %931 = vmatpush.bf16.msrb.mxu2 %v2621_v51  ;;  %v2794_v51 = vld [vmem:[%s4461_s2 + $0x54] sm:$0xf]  ;;  %v2840_v8 = vld [vmem:[%s4461_s2 + $0x1c4] sm:$0xf]  ;;  %v2446_v9 = vld [vmem:[%s4461_s2 + $0x1c8] sm:$0xf0] }
  0x3b   :  { %945 = vmatpush.bf16.msrb.mxu3 %v2685_v55  ;;  %v2326_v55 = vld [vmem:[%s4461_s2 + $0xd8] sm:$0xf0]  ;;  %v2265_v61 = vor.u32 %v2794_v51, %v2262_v52  ;;  %v2806_v16 = vld [vmem:[%s4461_s2 + $0xb4] sm:$0xf]  ;;  %v2449_v18 = vor.u32 %v2840_v8, %v2446_v9  ;;  %v2788_v27 = vld [vmem:[%s4461_s2 + $0x24] sm:$0xf] }
  0x3c   :  { %904 = vmatpush.bf16.msrb.mxu0 %v2485_v63  ;;  %v2329_v62 = vor.u32 %v2810_v53, %v2326_v55  ;;  %v2393_v63 = vor.u32 %v2826_v56, %v2390_v57  ;;  %v2246_v15 = vld [vmem:[%s4461_s2 + $0x38] sm:$0xf0]  ;;  %v2822_v20 = vld [vmem:[%s4461_s2 + $0x134] sm:$0xf]  ;;  %v2302_v31 = vld [vmem:[%s4461_s2 + $0xa8] sm:$0xf0] }
  0x3d   :  { %918 = vmatpush.bf16.msrb.mxu1 %v2549_v5  ;;  %v2318_v5 = vld [vmem:[%s4461_s2 + $0xc8] sm:$0xf0]  ;;  %v2374_v21 = vld [vmem:[%s4461_s2 + $0x138] sm:$0xf0]  ;;  %v2838_v22 = vld [vmem:[%s4461_s2 + $0x1b4] sm:$0xf] }
  0x3e   :  { %932 = vmatpush.bf16.msrb.mxu2 %v2613_v6  ;;  %v2824_v6 = vld [vmem:[%s4461_s2 + $0x144] sm:$0xf]  ;;  %v2321_v12 = vor.u32 %v2808_v3, %v2318_v5  ;;  %v2377_v26 = vor.u32 %v2822_v20, %v2374_v21  ;;  %v2430_v35 = vld [vmem:[%s4461_s2 + $0x1a8] sm:$0xf0]  ;;  %v2786_v40 = vld [vmem:[%s4461_s2 + $0x14] sm:$0xf] }
  0x3f   :  { %946 = vmatpush.bf16.msrb.mxu3 %v2677_v11  ;;  %v2257_v11 = vor.u32 %v2792_v0, %v2254_v2  ;;  %v2385_v13 = vor.u32 %v2824_v6, %v2382_v7  ;;  %v2820_v32 = vld [vmem:[%s4461_s2 + $0x124] sm:$0xf]  ;;  %v2230_v41 = vld [vmem:[%s4461_s2 + $0x18] sm:$0xf0]  ;;  %v2802_v42 = vld [vmem:[%s4461_s2 + $0x94] sm:$0xf] }
  0x40   :  { %905 = vmatpush.bf16.msrb.mxu0 %v2477_v19  ;;  %v2310_v19 = vld [vmem:[%s4461_s2 + $0xb8] sm:$0xf0]  ;;  %v2233_v52 = vor.u32 %v2786_v40, %v2230_v41  ;;  %v2784_v53 = vld [vmem:[%s4461_s2 + $0x4] sm:$0xf]  ;;  %v2286_v59 = vld [vmem:[%s4461_s2 + $0x88] sm:$0xf0] }
  0x41   :  { %919 = vmatpush.bf16.msrb.mxu1 %v2541_v23  ;;  %v2438_v23 = vld [vmem:[%s4461_s2 + $0x1b8] sm:$0xf0]  ;;  %v2313_v25 = vor.u32 %v2806_v16, %v2310_v19  ;;  %v2800_v55 = vld [vmem:[%s4461_s2 + $0x84] sm:$0xf]  ;;  %v2414_v0 = vld [vmem:[%s4461_s2 + $0x188] sm:$0xf0] }
  0x42   :  { %933 = vmatpush.bf16.msrb.mxu2 %v2605_v24  ;;  %v2249_v24 = vor.u32 %v2790_v14, %v2246_v15  ;;  %v2441_v30 = vor.u32 %v2838_v22, %v2438_v23  ;;  %v2294_v46 = vld [vmem:[%s4461_s2 + $0x98] sm:$0xf0]  ;;  %v2816_v60 = vld [vmem:[%s4461_s2 + $0x104] sm:$0xf]  ;;  %v2862_v2 = vld [vmem:[%s4461_s2 + $0x274] sm:$0xf] }
  0x43   :  { %947 = vmatpush.bf16.msrb.mxu3 %v2669_v28  ;;  %906 = vmatmul.bf16.vlgmr.msrb.gmra.mxu0 %v3524_v39  ;;  %v2238_v28 = vld [vmem:[%s4461_s2 + $0x28] sm:$0xf0]  ;;  %v2422_v51 = vld [vmem:[%s4461_s2 + $0x198] sm:$0xf0]  ;;  %v2297_v56 = vor.u32 %v2802_v42, %v2294_v46  ;;  %v2894_v7 = vld [vmem:[%s4461_s2 + $0x374] sm:$0xf] }
  0x44   :  { %954 = vmatpush.bf16.msra.mxu0 %v2281_v29  ;;  %920 = vmatmul.bf16.vlgmr.msrb.gmra.mxu1 %v3537_v44  ;;  %v2804_v29 = vld [vmem:[%s4461_s2 + $0xa4] sm:$0xf]  ;;  %v2241_v36 = vor.u32 %v2788_v27, %v2238_v28  ;;  %v2534_v3 = vld [vmem:[%s4461_s2 + $0x278] sm:$0xf0]  ;;  %v2910_v9 = vld [vmem:[%s4461_s2 + $0x3f4] sm:$0xf] }
  0x45   :  { %968 = vmatpush.bf16.msra.mxu1 %v2345_v33  ;;  %934 = vmatmul.bf16.vlgmr.msrb.gmra.mxu2 %v3535_v43  ;;  %v2366_v33 = vld [vmem:[%s4461_s2 + $0x128] sm:$0xf0]  ;;  %v2305_v37 = vor.u32 %v2804_v29, %v2302_v31  ;;  %v2598_v5 = vld [vmem:[%s4461_s2 + $0x2f8] sm:$0xf0]  ;;  %v2860_v14 = vld [vmem:[%s4461_s2 + $0x264] sm:$0xf] }
  0x46   :  { %982 = vmatpush.bf16.msra.mxu2 %v2409_v34  ;;  %948 = vmatmul.bf16.vlgmr.msrb.gmra.mxu3 %v3545_v47  ;;  %v2836_v34 = vld [vmem:[%s4461_s2 + $0x1a4] sm:$0xf]  ;;  %v2662_v8 = vld [vmem:[%s4461_s2 + $0x378] sm:$0xf0]  ;;  %v2526_v15 = vld [vmem:[%s4461_s2 + $0x268] sm:$0xf0] }
  0x47   :  { %996 = vmatpush.bf16.msra.mxu3 %v2473_v38  ;;  %v2369_v38 = vor.u32 %v2820_v32, %v2366_v33  ;;  %v2433_v45 = vor.u32 %v2836_v34, %v2430_v35  ;;  %v2876_v19 = vld [vmem:[%s4461_s2 + $0x2e4] sm:$0xf]  ;;  %v2590_v20 = vld [vmem:[%s4461_s2 + $0x2e8] sm:$0xf0]  ;;  %v2529_v28 = vor.u32 %v2860_v14, %v2526_v15  ;;  %v2858_v31 = vld [vmem:[%s4461_s2 + $0x254] sm:$0xf] }
  0x48   :  { %955 = vmatpush.bf16.msra.mxu0 %v2273_v48  ;;  %v2818_v48 = vld [vmem:[%s4461_s2 + $0x114] sm:$0xf]  ;;  %v2892_v21 = vld [vmem:[%s4461_s2 + $0x364] sm:$0xf]  ;;  %v2654_v22 = vld [vmem:[%s4461_s2 + $0x368] sm:$0xf0]  ;;  %v2593_v29 = vor.u32 %v2876_v19, %v2590_v20 }
  0x49   :  { %969 = vmatpush.bf16.msra.mxu1 %v2337_v49  ;;  %v2358_v49 = vld [vmem:[%s4461_s2 + $0x118] sm:$0xf0]  ;;  %v2874_v33 = vld [vmem:[%s4461_s2 + $0x2d4] sm:$0xf]  ;;  %v2510_v46 = vld [vmem:[%s4461_s2 + $0x248] sm:$0xf0] }
  0x4a   :  { %983 = vmatpush.bf16.msra.mxu2 %v2401_v50  ;;  %v2834_v50 = vld [vmem:[%s4461_s2 + $0x194] sm:$0xf]  ;;  %v2361_v57 = vor.u32 %v2818_v48, %v2358_v49  ;;  %v2518_v32 = vld [vmem:[%s4461_s2 + $0x258] sm:$0xf0]  ;;  %v2888_v48 = vld [vmem:[%s4461_s2 + $0x344] sm:$0xf] }
  0x4b   :  { %997 = vmatpush.bf16.msra.mxu3 %v2465_v54  ;;  %v2222_v54 = vld [vmem:[%s4461_s2 + $0x8] sm:$0xf0]  ;;  %v2582_v35 = vld [vmem:[%s4461_s2 + $0x2d8] sm:$0xf0]  ;;  %v2521_v40 = vor.u32 %v2858_v31, %v2518_v32  ;;  %v2850_v19 = vld [vmem:[%s4461_s2 + $0x214] sm:$0xf] }
  0x4c   :  { %956 = vmatpush.bf16.msra.mxu0 %v2265_v61  ;;  %v2350_v61 = vld [vmem:[%s4461_s2 + $0x108] sm:$0xf0]  ;;  %v2225_v6 = vor.u32 %v2784_v53, %v2222_v54  ;;  %v2585_v41 = vor.u32 %v2874_v33, %v2582_v35  ;;  %v2486_v20 = vld [vmem:[%s4461_s2 + $0x218] sm:$0xf0]  ;;  %v2848_v31 = vld [vmem:[%s4461_s2 + $0x204] sm:$0xf] }
  0x4d   :  { %970 = vmatpush.bf16.msra.mxu1 %v2329_v62  ;;  %v2425_v62 = vor.u32 %v2834_v50, %v2422_v51  ;;  %v2638_v49 = vld [vmem:[%s4461_s2 + $0x348] sm:$0xf0]  ;;  %v2904_v50 = vld [vmem:[%s4461_s2 + $0x3c4] sm:$0xf] }
  0x4e   :  { %984 = vmatpush.bf16.msra.mxu2 %v2393_v63  ;;  %v2832_v63 = vld [vmem:[%s4461_s2 + $0x184] sm:$0xf]  ;;  %v2702_v51 = vld [vmem:[%s4461_s2 + $0x3c8] sm:$0xf0]  ;;  %v2641_v54 = vor.u32 %v2888_v48, %v2638_v49 }
  0x4f   :  { %998 = vmatpush.bf16.msra.mxu3 %v2457_v4  ;;  %v2878_v4 = vld [vmem:[%s4461_s2 + $0x2f4] sm:$0xf]  ;;  %v2417_v16 = vor.u32 %v2832_v63, %v2414_v0  ;;  %v2694_v0 = vld [vmem:[%s4461_s2 + $0x3b8] sm:$0xf0]  ;;  %v2686_v14 = vld [vmem:[%s4461_s2 + $0x3a8] sm:$0xf0] }
  0x50   :  { %957 = vmatpush.bf16.msra.mxu0 %v2257_v11  ;;  %v2289_v11 = vor.u32 %v2800_v55, %v2286_v59  ;;  %v2601_v23 = vor.u32 %v2878_v4, %v2598_v5  ;;  %v2854_v55 = vld [vmem:[%s4461_s2 + $0x234] sm:$0xf]  ;;  %v2705_v59 = vor.u32 %v2904_v50, %v2702_v51  ;;  %v2852_v5 = vld [vmem:[%s4461_s2 + $0x224] sm:$0xf]  ;;  %v2478_v32 = vld [vmem:[%s4461_s2 + $0x208] sm:$0xf0] }
  0x51   :  { %971 = vmatpush.bf16.msra.mxu1 %v2321_v12  ;;  %v2353_v12 = vor.u32 %v2816_v60, %v2350_v61  ;;  %v2566_v60 = vld [vmem:[%s4461_s2 + $0x2b8] sm:$0xf0]  ;;  %v2886_v61 = vld [vmem:[%s4461_s2 + $0x334] sm:$0xf]  ;;  %v2864_v33 = vld [vmem:[%s4461_s2 + $0x284] sm:$0xf] }
  0x52   :  { %985 = vmatpush.bf16.msra.mxu2 %v2385_v13  ;;  %v2726_v13 = vld [vmem:[%s4461_s2 + $0x3f8] sm:$0xf0]  ;;  %v2902_v63 = vld [vmem:[%s4461_s2 + $0x3b4] sm:$0xf]  ;;  %v2542_v35 = vld [vmem:[%s4461_s2 + $0x288] sm:$0xf0] }
  0x53   :  { %999 = vmatpush.bf16.msra.mxu3 %v2449_v18  ;;  %v2537_v18 = vor.u32 %v2862_v2, %v2534_v3  ;;  %v2729_v27 = vor.u32 %v2910_v9, %v2726_v13  ;;  %v2558_v9 = vld [vmem:[%s4461_s2 + $0x2a8] sm:$0xf0]  ;;  %v2900_v13 = vld [vmem:[%s4461_s2 + $0x3a4] sm:$0xf]  ;;  %v1157_v51 = vld [vmem:[%s4463_s3 + $0x58] sm:$0xff] }
  0x54   :  { %958 = vmatpush.bf16.msra.mxu0 %v2249_v24  ;;  %v2665_v24 = vor.u32 %v2894_v7, %v2662_v8  ;;  %v2868_v7 = vld [vmem:[%s4461_s2 + $0x2a4] sm:$0xf]  ;;  %v2697_v8 = vor.u32 %v2902_v63, %v2694_v0 }
  0x55   :  { %972 = vmatpush.bf16.msra.mxu1 %v2313_v25  ;;  %v2908_v25 = vld [vmem:[%s4461_s2 + $0x3e4] sm:$0xf] }
  0x56   :  { %986 = vmatpush.bf16.msra.mxu2 %v2377_v26  ;;  %v2718_v26 = vld [vmem:[%s4461_s2 + $0x3e8] sm:$0xf0] }
  0x57   :  { %1000 = vmatpush.bf16.msra.mxu3 %v2441_v30  ;;  %v2657_v30 = vor.u32 %v2892_v21, %v2654_v22  ;;  %v2721_v34 = vor.u32 %v2908_v25, %v2718_v26  ;;  %v2866_v21 = vld [vmem:[%s4461_s2 + $0x294] sm:$0xf]  ;;  %v2689_v22 = vor.u32 %v2900_v13, %v2686_v14  ;;  %v2614_v25 = vld [vmem:[%s4461_s2 + $0x318] sm:$0xf0] }
  0x58   :  { %959 = vmatpush.bf16.msra.mxu0 %v2241_v36  ;;  %v2890_v36 = vld [vmem:[%s4461_s2 + $0x354] sm:$0xf] }
  0x59   :  { %973 = vmatpush.bf16.msra.mxu1 %v2305_v37  ;;  %v2646_v37 = vld [vmem:[%s4461_s2 + $0x358] sm:$0xf0]  ;;  %v2898_v26 = vld [vmem:[%s4461_s2 + $0x394] sm:$0xf] }
  0x5a   :  { %987 = vmatpush.bf16.msra.mxu2 %v2369_v38  ;;  %v2906_v38 = vld [vmem:[%s4461_s2 + $0x3d4] sm:$0xf]  ;;  %v2649_v42 = vor.u32 %v2890_v36, %v2646_v37  ;;  %v2880_v36 = vld [vmem:[%s4461_s2 + $0x304] sm:$0xf]  ;;  %v2606_v37 = vld [vmem:[%s4461_s2 + $0x308] sm:$0xf0] }
  0x5b   :  { %1001 = vmatpush.bf16.msra.mxu3 %v2433_v45  ;;  %v2856_v45 = vld [vmem:[%s4461_s2 + $0x244] sm:$0xf]  ;;  %v1148_v14 = vld [vmem:[%s4463_s3 + $0x10] sm:$0xff] }
  0x5c   :  { %960 = vmatpush.bf16.msra.mxu0 %v2233_v52  ;;  %v2513_v52 = vor.u32 %v2856_v45, %v2510_v46  ;;  %v3898_v46 = vld [vmem:[%s4464_s4] ss:$8 sm:$0x3] }
  0x5d   :  { %974 = vmatpush.bf16.msra.mxu1 %v2297_v56  ;;  %v2502_v56 = vld [vmem:[%s4461_s2 + $0x238] sm:$0xf0] }
  0x5e   :  { %988 = vmatpush.bf16.msra.mxu2 %v2361_v57  ;;  %v2870_v57 = vld [vmem:[%s4461_s2 + $0x2b4] sm:$0xf]  ;;  %v2505_v2 = vor.u32 %v2854_v55, %v2502_v56  ;;  %v1155_v56 = vld [vmem:[%s4463_s3 + $0x48] sm:$0xff] }
  0x5f   :  { %1002 = vmatpush.bf16.msra.mxu3 %v2425_v62  ;;  %v2630_v62 = vld [vmem:[%s4461_s2 + $0x338] sm:$0xf0]  ;;  %v2569_v3 = vor.u32 %v2870_v57, %v2566_v60  ;;  %v1154_v60 = vld [vmem:[%s4463_s3 + $0x40] sm:$0xff] }
  0x60   :  { %961 = vmatpush.bf16.msra.mxu0 %v2225_v6  ;;  %v2633_v4 = vor.u32 %v2886_v61, %v2630_v62  ;;  %v2494_v6 = vld [vmem:[%s4461_s2 + $0x228] sm:$0xf0]  ;;  %v1153_v61 = vld [vmem:[%s4463_s3 + $0x38] sm:$0xff] }
  0x61   :  { %975 = vmatpush.bf16.msra.mxu1 %v2289_v11  ;;  %v2884_v11 = vld [vmem:[%s4461_s2 + $0x324] sm:$0xf]  ;;  %v2497_v15 = vor.u32 %v2852_v5, %v2494_v6  ;;  %v1151_v5 = vld [vmem:[%s4463_s3 + $0x28] sm:$0xff] }
  0x62   :  { %989 = vmatpush.bf16.msra.mxu2 %v2353_v12  ;;  %v2622_v12 = vld [vmem:[%s4461_s2 + $0x328] sm:$0xf0] }
  0x63   :  { %1003 = vmatpush.bf16.msra.mxu3 %v2417_v16  ;;  %962 = vmatmul.bf16.vlgmr.msra.gmra.mxu0 %v3302_v58  ;;  %v2872_v58 = vld [vmem:[%s4461_s2 + $0x2c4] sm:$0xf]  ;;  %v2561_v16 = vor.u32 %v2868_v7, %v2558_v9 }
  0x64   :  { %1010 = vmatpush.bf16.msrb.mxu0 %v2537_v18  ;;  %976 = vmatmul.bf16.vlgmr.msra.gmra.mxu1 %v3338_v10  ;;  %v2574_v10 = vld [vmem:[%s4461_s2 + $0x2c8] sm:$0xf0]  ;;  %v2625_v18 = vor.u32 %v2884_v11, %v2622_v12  ;;  %v1150_v9 = vld [vmem:[%s4463_s3 + $0x20] sm:$0xff]  ;;  %v1149_v12 = vld [vmem:[%s4463_s3 + $0x18] sm:$0xff] }
  0x65   :  { %1024 = vmatpush.bf16.msrb.mxu1 %v2601_v23  ;;  %990 = vmatmul.bf16.vlgmr.msra.gmra.mxu2 %v3316_v1  ;;  %v2710_v1 = vld [vmem:[%s4461_s2 + $0x3d8] sm:$0xf0]  ;;  %v2577_v53 = vor.u32 %v2872_v58, %v2574_v10  ;;  %v158_v10 = vperm.slane %v3898_v46, 0 }
  0x66   :  { %1038 = vmatpush.bf16.msrb.mxu2 %v2665_v24  ;;  %1004 = vmatmul.bf16.vlgmr.msra.gmra.mxu3 %v3352_v17  ;;  %v2713_v17 = vor.u32 %v2906_v38, %v2710_v1  ;;  %v2550_v23 = vld [vmem:[%s4461_s2 + $0x298] sm:$0xf0]  ;;  %v2882_v24 = vld [vmem:[%s4461_s2 + $0x314] sm:$0xf]  ;;  %v2896_v38 = vld [vmem:[%s4461_s2 + $0x384] sm:$0xf] }
  0x67   :  { %1052 = vmatpush.bf16.msrb.mxu3 %v2729_v27  ;;  %v2678_v27 = vld [vmem:[%s4461_s2 + $0x398] sm:$0xf0]  ;;  %v2670_v1 = vld [vmem:[%s4461_s2 + $0x388] sm:$0xf0] }
  0x68   :  { %1011 = vmatpush.bf16.msrb.mxu0 %v2529_v28  ;;  %v2489_v28 = vor.u32 %v2850_v19, %v2486_v20  ;;  %v2673_v45 = vor.u32 %v2896_v38, %v2670_v1  ;;  %v1147_v20 = vld [vmem:[%s4463_s3 + $0x8] sm:$0xff] }
  0x69   :  { %1025 = vmatpush.bf16.msrb.mxu1 %v2593_v29  ;;  %v2553_v29 = vor.u32 %v2866_v21, %v2550_v23  ;;  %v1146_v21 = vld [vmem:[%s4463_s3] sm:$0xff] }
  0x6a   :  { %1039 = vmatpush.bf16.msrb.mxu2 %v2657_v30  ;;  %v2617_v30 = vor.u32 %v2882_v24, %v2614_v25 }
  0x6b   :  { %1053 = vmatpush.bf16.msrb.mxu3 %v2721_v34  ;;  %v2681_v34 = vor.u32 %v2898_v26, %v2678_v27 }
  0x6c   :  { %1012 = vmatpush.bf16.msrb.mxu0 %v2521_v40  ;;  %v2481_v40 = vor.u32 %v2848_v31, %v2478_v32 }
  0x6d   :  { %1026 = vmatpush.bf16.msrb.mxu1 %v2585_v41  ;;  %v2545_v41 = vor.u32 %v2864_v33, %v2542_v35 }
  0x6e   :  { %1040 = vmatpush.bf16.msrb.mxu2 %v2649_v42  ;;  %v2609_v42 = vor.u32 %v2880_v36, %v2606_v37 }
  0x6f   :  { %1054 = vmatpush.bf16.msrb.mxu3 %v2713_v17  ;;  %v1161_v17 = vld [vmem:[%s4463_s3 + $0x78] sm:$0xff] }
  0x70   :  { %1013 = vmatpush.bf16.msrb.mxu0 %v2513_v52 }
  0x71   :  { %1027 = vmatpush.bf16.msrb.mxu1 %v2577_v53 }
  0x72   :  { %1041 = vmatpush.bf16.msrb.mxu2 %v2641_v54  ;;  %v1156_v54 = vld [vmem:[%s4463_s3 + $0x50] sm:$0xff] }
  0x73   :  { %1055 = vmatpush.bf16.msrb.mxu3 %v2705_v59 }
  0x74   :  { %1014 = vmatpush.bf16.msrb.mxu0 %v2505_v2 }
  0x75   :  { %1028 = vmatpush.bf16.msrb.mxu1 %v2569_v3  ;;  %v1152_v3 = vld [vmem:[%s4463_s3 + $0x30] sm:$0xff] }
  0x76   :  { %1042 = vmatpush.bf16.msrb.mxu2 %v2633_v4 }
  0x77   :  { %1056 = vmatpush.bf16.msrb.mxu3 %v2697_v8 }
  0x78   :  { %1015 = vmatpush.bf16.msrb.mxu0 %v2497_v15 }
  0x79   :  { %1029 = vmatpush.bf16.msrb.mxu1 %v2561_v16 }
  0x7a   :  { %1043 = vmatpush.bf16.msrb.mxu2 %v2625_v18 }
  0x7b   :  { %1057 = vmatpush.bf16.msrb.mxu3 %v2689_v22 }
  0x7c   :  { %1016 = vmatpush.bf16.msrb.mxu0 %v2489_v28 }
  0x7d   :  { %1030 = vmatpush.bf16.msrb.mxu1 %v2553_v29 }
  0x7e   :  { %1044 = vmatpush.bf16.msrb.mxu2 %v2617_v30 }
  0x7f   :  { %1058 = vmatpush.bf16.msrb.mxu3 %v2681_v34 }
  0x80   :  { %1017 = vmatpush.bf16.msrb.mxu0 %v2481_v40 }
  0x81   :  { %1031 = vmatpush.bf16.msrb.mxu1 %v2545_v41 }
  0x82   :  { %1045 = vmatpush.bf16.msrb.mxu2 %v2609_v42 }
  0x83   :  { %1059 = vmatpush.bf16.msrb.mxu3 %v2673_v45  ;;  %1018 = vmatmul.bf16.vlgmr.msrb.gmra.mxu0 %v3524_v39  ;;  %v1160_v39 = vld [vmem:[%s4463_s3 + $0x70] sm:$0xff] }
  0x84   :  { %1032 = vmatmul.bf16.vlgmr.msrb.gmra.mxu1 %v3537_v44  ;;  %1178 = vmatpush.msra.mxu0 %v1161_v17 }
  0x85   :  { %1046 = vmatmul.bf16.vlgmr.msrb.gmra.mxu2 %v3535_v43  ;;  %v1159_v43 = vld [vmem:[%s4463_s3 + $0x68] sm:$0xff] }
  0x86   :  { %1060 = vmatmul.bf16.vlgmr.msrb.gmra.mxu3 %v3545_v47  ;;  %1179 = vmatpush.msra.mxu0 %v1160_v39  ;;  %v1158_v47 = vld [vmem:[%s4463_s3 + $0x60] sm:$0xff] }
  0x88   :  { %1180 = vmatpush.msra.mxu0 %v1159_v43 }
  0x8a   :  { %1181 = vmatpush.msra.mxu0 %v1158_v47  ;;  %v1176_v47 = vld [vmem:[%s4463_s3 + $0xf0] sm:$0xff] }
  0x8c   :  { %1182 = vmatpush.msra.mxu0 %v1157_v51 }
  0x8e   :  { %1183 = vmatpush.msra.mxu0 %v1156_v54  ;;  %v159_v54 = vperm.slane %v3898_v46, 1 }
  0x90   :  { %1184 = vmatpush.msra.mxu0 %v1155_v56 }
  0x92   :  { %1185 = vmatpush.msra.mxu0 %v1154_v60 }
  0x94   :  { %1186 = vmatpush.msra.mxu0 %v1153_v61  ;;  %v1173_v61 = vld [vmem:[%s4463_s3 + $0xd8] sm:$0xff] }
  0x96   :  { %1187 = vmatpush.msra.mxu0 %v1152_v3 }
  0x98   :  { %1188 = vmatpush.msra.mxu0 %v1151_v5 }
  0x9a   :  { %1189 = vmatpush.msra.mxu0 %v1150_v9  ;;  %v1169_v9 = vld [vmem:[%s4463_s3 + $0xb8] sm:$0xff] }
  0x9c   :  { %1190 = vmatpush.msra.mxu0 %v1149_v12 }
  0x9e   :  { %1191 = vmatpush.msra.mxu0 %v1148_v14 }
  0xa0   :  { %v851_v58 = vpop.f32.mrf.mxu0  ;;  %1192 = vmatpush.msra.mxu0 %v1147_v20 }
  0xa1   :  { %v865_v48 = vpop.f32.mrf.mxu1  ;;  %v852_v44 = vadd.f32 %v851_v58, %v158_v10 }
  0xa2   :  { %1193 = vmatpush.msra.mxu0 %v1146_v21  ;;  %v1166_v21 = vld [vmem:[%s4463_s3 + $0xa0] sm:$0xff] }
  0xa3   :  { %v866_v52 = vadd.f32 %v865_v48, %v852_v44  ;;  %v1177_v48 = vld [vmem:[%s4463_s3 + $0xf8] sm:$0xff] }
  0xa4   :  { %1201 = vmatpush.msra.mxu1 %v1177_v48 }
  0xa6   :  { %1202 = vmatpush.msra.mxu1 %v1176_v47 }
  0xa8   :  { %v879_v49 = vpop.f32.mrf.mxu2  ;;  %v853_v53 = vpop.f32.mrf.mxu0 }
  0xa9   :  { %v893_v50 = vpop.f32.mrf.mxu3  ;;  %v867_v55 = vpop.f32.mrf.mxu1  ;;  %v880_v57 = vadd.f32 %v879_v49, %v866_v52  ;;  %v854_v59 = vadd.f32 %v853_v53, %v158_v10  ;;  %v1175_v53 = vld [vmem:[%s4463_s3 + $0xe8] sm:$0xff] }
  0xaa   :  { %1203 = vmatpush.msra.mxu1 %v1175_v53 }
  0xab   :  { %v894_v62 = vadd.f32 %v893_v50, %v880_v57  ;;  %v868_v0 = vadd.f32 %v867_v55, %v854_v59  ;;  %v1174_v57 = vld [vmem:[%s4463_s3 + $0xe0] sm:$0xff] }
  0xac   :  { %1204 = vmatpush.msra.mxu1 %v1174_v57 }
  0xae   :  { %1205 = vmatpush.msra.mxu1 %v1173_v61 }
  0xb0   :  { %v881_v63 = vpop.f32.mrf.mxu2 }
  0xb1   :  { %v895_v2 = vpop.f32.mrf.mxu3  ;;  %v882_v8 = vadd.f32 %v881_v63, %v868_v0 }
  0xb3   :  { %v896_v13 = vadd.f32 %v895_v2, %v882_v8  ;;  %v1172_v2 = vld [vmem:[%s4463_s3 + $0xd0] sm:$0xff] }
  0xb4   :  { %1206 = vmatpush.msra.mxu1 %v1172_v2 }
  0xc0   :  { %v907_v4 = vpop.f32.mrf.mxu0 }
  0xc1   :  { %v908_v6 = vadd.f32 %v907_v4, %v894_v62  ;;  %v921_v7 = vpop.f32.mrf.mxu1  ;;  %v1171_v4 = vld [vmem:[%s4463_s3 + $0xc8] sm:$0xff] }
  0xc2   :  { %1207 = vmatpush.msra.mxu1 %v1171_v4 }
  0xc3   :  { %v922_v11 = vadd.f32 %v921_v7, %v908_v6  ;;  %v1170_v7 = vld [vmem:[%s4463_s3 + $0xc0] sm:$0xff] }
  0xc4   :  { %1208 = vmatpush.msra.mxu1 %v1170_v7  ;;  %v1225_v7 = vld [vmem:[%s4463_s3 + $0x108] sm:$0xff] }
  0xc6   :  { %1209 = vmatpush.msra.mxu1 %v1169_v9  ;;  %v1332_v9 = vld [vmem:[%s4463_s3 + $0x148] sm:$0xff] }
  0xc8   :  { %v935_v15 = vpop.f32.mrf.mxu2  ;;  %v909_v18 = vpop.f32.mrf.mxu0 }
  0xc9   :  { %v936_v16 = vadd.f32 %v935_v15, %v922_v11  ;;  %v949_v19 = vpop.f32.mrf.mxu3  ;;  %v910_v22 = vadd.f32 %v909_v18, %v896_v13  ;;  %v923_v24 = vpop.f32.mrf.mxu1  ;;  %v1168_v13 = vld [vmem:[%s4463_s3 + $0xb0] sm:$0xff]  ;;  %v1167_v15 = vld [vmem:[%s4463_s3 + $0xa8] sm:$0xff] }
  0xca   :  { %1210 = vmatpush.msra.mxu1 %v1168_v13  ;;  %v1329_v13 = vld [vmem:[%s4463_s3 + $0x130] sm:$0xff] }
  0xcb   :  { %v950_v23 = vadd.f32 %v949_v19, %v936_v16  ;;  %v924_v26 = vadd.f32 %v923_v24, %v910_v22  ;;  %v1165_v24 = vld [vmem:[%s4463_s3 + $0x98] sm:$0xff] }
  0xcc   :  { %1211 = vmatpush.msra.mxu1 %v1167_v15 }
  0xcd   :  { %v2730_v25 = vmul.f32 -1.442695, %v950_v23 }
  0xce   :  { %1212 = vmatpush.msra.mxu1 %v1166_v21 }
  0xcf   :  { %2924 = vpow2.f32 %v2730_v25 }
  0xd0   :  { %v937_v27 = vpop.f32.mrf.mxu2  ;;  %1213 = vmatpush.msra.mxu1 %v1165_v24  ;;  %v1328_v24 = vld [vmem:[%s4465_s1 + $0x8] sm:$0xff] }
  0xd1   :  { %v938_v28 = vadd.f32 %v937_v27, %v924_v26  ;;  %v951_v29 = vpop.f32.mrf.mxu3  ;;  %v1164_v26 = vld [vmem:[%s4463_s3 + $0x90] sm:$0xff] }
  0xd2   :  { %1214 = vmatpush.msra.mxu1 %v1164_v26  ;;  %v1368_v26 = vld [vmem:[%s4463_s3 + $0x168] sm:$0xff] }
  0xd3   :  { %v952_v30 = vadd.f32 %v951_v29, %v938_v28  ;;  %v1163_v29 = vld [vmem:[%s4463_s3 + $0x88] sm:$0xff] }
  0xd4   :  { %1215 = vmatpush.msra.mxu1 %v1163_v29  ;;  %v1366_v29 = vld [vmem:[%s4463_s3 + $0x158] sm:$0xff] }
  0xd5   :  { %v2925_v31 = vpop.eup %2924  ;;  %v2732_v32 = vmul.f32 -1.442695, %v952_v30 }
  0xd6   :  { %v1078_v33 = vadd.f32 1.0, %v2925_v31 }
  0xd7   :  { %2926 = vpow2.f32 %v2732_v32 }
  0xd8   :  { %2928 = vrcp.f32 %v1078_v33  ;;  %v1093_v1 = vand.u32 2147483648, %v1078_v33  ;;  %vm1087_vm0 = vweird.f32 %v1078_v33  ;;  %v1091_v41 = vand.u32 2147483647, %v1078_v33 }
  0xda   :  { %v1094_v58 = vor.u32 1.1754944e-38, %v1093_v1  ;;  %vm1092_vm3 = vcmp.eq.f32.partialorder %v1091_v41, 8.507059e+37 }
  0xdd   :  { %v2927_v34 = vpop.eup %2926 }
  0xde   :  { %v2929_v35 = vpop.eup %2928  ;;  %v1080_v36 = vadd.f32 1.0, %v2927_v34  ;;  %v1162_v34 = vld [vmem:[%s4463_s3 + $0x80] sm:$0xff] }
  0xdf   :  { %v1083_v37 = vmul.f32 %v2929_v35, %v1078_v33  ;;  %vm1088_vm1 = vweird.f32 %v2929_v35  ;;  %1216 = vmatpush.msra.mxu1 %v1162_v34 }
  0xe0   :  { %2930 = vrcp.f32 %v1080_v36  ;;  %vm1089_vm2 = vmor %vm1087_vm0, %vm1088_vm1  ;;  %v963_v49 = vpop.f32.mrf.mxu0  ;;  %v1123_v50 = vand.u32 2147483648, %v1080_v36  ;;  %v1121_v52 = vand.u32 2147483647, %v1080_v36  ;;  %vm1117_vm5 = vweird.f32 %v1080_v36 }
  0xe1   :  { %v1084_v38 = vsub.f32 1.0, %v1083_v37  ;;  %v977_v55 = vpop.f32.mrf.mxu1  ;;  %v964_v62 = vadd.f32 %v963_v49, %v159_v54  ;;  %vm1228_vm0 = vcmask 261120   ;;  %vm1835_vm1 = vcmask 130112  }
  0xe2   :  { %v1124_v59 = vor.u32 1.1754944e-38, %v1123_v50  ;;  %vm1122_vm7 = vcmp.eq.f32.partialorder %v1121_v52, 8.507059e+37 }
  0xe3   :  { %v1085_v40 = vmul.f32 %v2929_v35, %v1084_v38  ;;  %v978_v5 = vadd.f32 %v977_v55, %v964_v62 }
  0xe5   :  { %v1086_v42 = vadd.f32 %v2929_v35, %v1085_v40 }
  0xe6   :  { %v2931_v45 = vpop.eup %2930 }
  0xe7   :  { %v1090_v17 = vsel %vm1089_vm2, %v2929_v35, %v1086_v42  ;;  %v1113_v10 = vmul.f32 %v2931_v45, %v1080_v36  ;;  %vm1118_vm4 = vweird.f32 %v2931_v45  ;;  %vm1414_vm2 = vcmask 64512  }
  0xe8   :  { %v1095_v39 = vsel %vm1092_vm3, %v1094_v58, %v1090_v17  ;;  %vm1119_vm6 = vmor %vm1117_vm5, %vm1118_vm4  ;;  %v991_v46 = vpop.f32.mrf.mxu2  ;;  %v965_v6 = vpop.f32.mrf.mxu0 }
  0xe9   :  { %v1142_v43 = vmul.f32 %v1095_v39, %v950_v23  ;;  %v1114_v44 = vsub.f32 1.0, %v1113_v10  ;;  %v1005_v3 = vpop.f32.mrf.mxu3  ;;  %v979_v8 = vpop.f32.mrf.mxu1  ;;  %v992_v11 = vadd.f32 %v991_v46, %v978_v5  ;;  %v966_v12 = vadd.f32 %v965_v6, %v159_v54  ;;  %v1227_v5 = vld [vmem:[%s4463_s3 + $0x118] sm:$0xff]  ;;  %v1226_v6 = vld [vmem:[%s4463_s3 + $0x110] sm:$0xff] }
  0xea   :  { %2912 = vmatpush.msra.mxu2 %v1227_v5  ;;  %1247 = vmatpush.msrb.mxu0 %v1227_v5 }
  0xeb   :  { %1194 = vmatmul.f32.vlgmr.msra.gmra.mxu0 %v1142_v43  ;;  %v1115_v51 = vmul.f32 %v2931_v45, %v1114_v44  ;;  %v1006_v16 = vadd.f32 %v1005_v3, %v992_v11  ;;  %v980_v18 = vadd.f32 %v979_v8, %v966_v12  ;;  %1278 = vmatpush.msra.mxu3 %v1227_v5  ;;  %v1224_v8 = vld [vmem:[%s4463_s3 + $0x100] sm:$0xff]  ;;  %v1330_v12 = vld [vmem:[%s4463_s3 + $0x138] sm:$0xff] }
  0xec   :  { %1248 = vmatpush.msrb.mxu0 %v1226_v6  ;;  %2913 = vmatpush.msra.mxu2 %v1226_v6  ;;  %v1331_v11 = vld [vmem:[%s4463_s3 + $0x140] sm:$0xff] }
  0xed   :  { %v1116_v56 = vadd.f32 %v2931_v45, %v1115_v51  ;;  %1279 = vmatpush.msra.mxu3 %v1226_v6 }
  0xee   :  { %1249 = vmatpush.msrb.mxu0 %v1225_v7  ;;  %2914 = vmatpush.msra.mxu2 %v1225_v7 }
  0xef   :  { %v1120_v60 = vsel %vm1119_vm6, %v2931_v45, %v1116_v56  ;;  %1280 = vmatpush.msra.mxu3 %v1225_v7 }
  0xf0   :  { %v1125_v63 = vsel %vm1122_vm7, %v1124_v59, %v1120_v60  ;;  %v993_v14 = vpop.f32.mrf.mxu2  ;;  %1250 = vmatpush.msrb.mxu0 %v1224_v8  ;;  %2915 = vmatpush.msra.mxu2 %v1224_v8 }
  0xf1   :  { %v1144_v0 = vmul.f32 %v1125_v63, %v952_v30  ;;  %v1007_v19 = vpop.f32.mrf.mxu3  ;;  %v994_v25 = vadd.f32 %v993_v14, %v980_v18  ;;  %1281 = vmatpush.msra.mxu3 %v1224_v8 }
  0xf2   :  { %1353 = vmatpush.msrb.mxu2 %v1332_v9 }
  0xf3   :  { %1197 = vmatmul.f32.gmra.mxu0 %v1144_v0  ;;  %v1008_v30 = vadd.f32 %v1007_v19, %v994_v25  ;;  %v1369_v25 = vld [vmem:[%s4463_s3 + $0x170] sm:$0xff] }
  0xf4   :  { %1354 = vmatpush.msrb.mxu2 %v1331_v11  ;;  %1456 = vmatpush.msrb.mxu3 %v1369_v25  ;;  %v1376_v25 = vld [vmem:[%s4464_s4 + $0x48] sm:$0xff] }
  0xf6   :  { %1355 = vmatpush.msrb.mxu2 %v1330_v12  ;;  %1457 = vmatpush.msrb.mxu3 %v1368_v26  ;;  %v2920_v26 = vld [vmem:[%s4463_s3 + $0x178] ss:$0 sm:$0xff] }
  0xf8   :  { %1356 = vmatpush.msrb.mxu2 %v1329_v13 }
 0x100   :  { %v1019_v20 = vpop.f32.mrf.mxu0 }
 0x101   :  { %v1020_v22 = vadd.f32 %v1019_v20, %v1006_v16  ;;  %v1033_v23 = vpop.f32.mrf.mxu1 }
 0x103   :  { %v1034_v27 = vadd.f32 %v1033_v23, %v1020_v22  ;;  %v1327_v23 = vld [vmem:[%s4465_s1] sm:$0xff] }
 0x108   :  { %v1047_v28 = vpop.f32.mrf.mxu2  ;;  %v1021_v33 = vpop.f32.mrf.mxu0 }
 0x109   :  { %v1048_v31 = vadd.f32 %v1047_v28, %v1034_v27  ;;  %v1061_v32 = vpop.f32.mrf.mxu3  ;;  %v1022_v36 = vadd.f32 %v1021_v33, %v1008_v30  ;;  %v1035_v38 = vpop.f32.mrf.mxu1  ;;  %v1367_v27 = vld [vmem:[%s4463_s3 + $0x160] sm:$0xff] }
 0x10a   :  { %1458 = vmatpush.msrb.mxu3 %v1367_v27  ;;  %v1373_v27 = vld [vmem:[%s4464_s4 + $0x30] sm:$0xff] }
 0x10b   :  { %v1062_v35 = vadd.f32 %v1061_v32, %v1048_v31  ;;  %v1036_v1 = vadd.f32 %v1035_v38, %v1022_v36 }
 0x10c   :  { %1459 = vmatpush.msrb.mxu3 %v1366_v29 }
 0x10d   :  { %v2731_v37 = vmul.f32 -1.442695, %v1062_v35 }
 0x10f   :  { %2932 = vpow2.f32 %v2731_v37 }
 0x110   :  { %v1049_v40 = vpop.f32.mrf.mxu2 }
 0x111   :  { %v1050_v41 = vadd.f32 %v1049_v40, %v1036_v1  ;;  %v1063_v42 = vpop.f32.mrf.mxu3  ;;  %v2918_v40 = vld [vmem:[%s4463_s3 + $0x150] ss:$0 sm:$0xff] }
 0x113   :  { %v1064_v45 = vadd.f32 %v1063_v42, %v1050_v41 }
 0x115   :  { %v2933_v58 = vpop.eup %2932  ;;  %v2733_v17 = vmul.f32 -1.442695, %v1064_v45 }
 0x116   :  { %v1079_v10 = vadd.f32 1.0, %v2933_v58 }
 0x117   :  { %2934 = vpow2.f32 %v2733_v17 }
 0x118   :  { %2936 = vrcp.f32 %v1079_v10  ;;  %v1108_v49 = vand.u32 2147483648, %v1079_v10  ;;  %v1106_v51 = vand.u32 2147483647, %v1079_v10  ;;  %vm1102_vm9 = vweird.f32 %v1079_v10 }
 0x11a   :  { %v1109_v54 = vor.u32 1.1754944e-38, %v1108_v49  ;;  %vm1107_vm11 = vcmp.eq.f32.partialorder %v1106_v51, 8.507059e+37 }
 0x11d   :  { %v2935_v48 = vpop.eup %2934 }
 0x11e   :  { %v2937_v39 = vpop.eup %2936  ;;  %v1081_v43 = vadd.f32 1.0, %v2935_v48 }
 0x11f   :  { %v1098_v44 = vmul.f32 %v2937_v39, %v1079_v10  ;;  %vm1103_vm8 = vweird.f32 %v2937_v39 }
 0x120   :  { %2938 = vrcp.f32 %v1081_v43  ;;  %vm1104_vm10 = vmor %vm1102_vm9, %vm1103_vm8  ;;  %v1138_v61 = vand.u32 2147483648, %v1081_v43  ;;  %v1136_v63 = vand.u32 2147483647, %v1081_v43  ;;  %vm1132_vm13 = vweird.f32 %v1081_v43 }
 0x121   :  { %v1099_v47 = vsub.f32 1.0, %v1098_v44 }
 0x122   :  { %v1139_v0 = vor.u32 1.1754944e-38, %v1138_v61  ;;  %vm1137_vm15 = vcmp.eq.f32.partialorder %v1136_v63, 8.507059e+37 }
 0x123   :  { %v1100_v50 = vmul.f32 %v2937_v39, %v1099_v47 }
 0x125   :  { %v1101_v52 = vadd.f32 %v2937_v39, %v1100_v50  ;;  %v2917_v50 = vld [vmem:[%s4463_s3 + $0x120] ss:$0 sm:$0xff] }
 0x126   :  { %v2939_v53 = vpop.eup %2938 }
 0x127   :  { %v1105_v55 = vsel %vm1104_vm10, %v2937_v39, %v1101_v52  ;;  %v1128_v56 = vmul.f32 %v2939_v53, %v1081_v43  ;;  %vm1133_vm12 = vweird.f32 %v2939_v53 }
 0x128   :  { %v1110_v57 = vsel %vm1107_vm11, %v1109_v54, %v1105_v55  ;;  %vm1134_vm14 = vmor %vm1132_vm13, %vm1133_vm12 }
 0x129   :  { %v1143_v59 = vmul.f32 %v1110_v57, %v1062_v35  ;;  %v1129_v60 = vsub.f32 1.0, %v1128_v56  ;;  %v2919_v56 = vld [vmem:[%s4463_s3 + $0x128] ss:$0 sm:$0xff] }
 0x12b   :  { %1217 = vmatmul.f32.vlgmr.msra.gmra.mxu1 %v1143_v59  ;;  %v1130_v62 = vmul.f32 %v2939_v53, %v1129_v60 }
 0x12d   :  { %v1131_v46 = vadd.f32 %v2939_v53, %v1130_v62 }
 0x12f   :  { %v1135_v2 = vsel %vm1134_vm14, %v2939_v53, %v1131_v46 }
 0x130   :  { %v1140_v3 = vsel %vm1137_vm15, %v1139_v0, %v1135_v2 }
 0x131   :  { %v1145_v4 = vmul.f32 %v1140_v3, %v1064_v45 }
 0x133   :  { %1220 = vmatmul.f32.gmra.mxu1 %v1145_v4 }
 0x168   :  { %v1195_v14 = vpop.f32.mrf.mxu0 }
 0x170   :  { %v1198_v19 = vpop.f32.mrf.mxu0 }
 0x1a8   :  { %v1218_v15 = vpop.f32.mrf.mxu1 }
 0x1a9   :  { %v1219_v16 = vadd.f32 %v1218_v15, %v1195_v14 }
 0x1ab   :  { %v1258_v18 = vmul.f32 %v1219_v16, %v1219_v16  ;;  %2734 = vmatmul.msk.f32.vlgmr.msrb.gmra.mxu0 %vm1228_vm0, %v1219_v16 }
 0x1ad   :  { %2736 = vmatmul.msk.f32.vlgmr.msra.gmra.mxu3 %vm1228_vm0, %v1258_v18 }
 0x1b0   :  { %v1221_v20 = vpop.f32.mrf.mxu1 }
 0x1b1   :  { %v4024_v21 = vadd.f32 %v1221_v20, %v1198_v19 }
 0x1b3   :  { %2735 = vmatmul.msk.f32.vlgmr.msra.gmra.mxu2 %vm1228_vm0, %v4024_v21  ;;  %v1259_v22 = vmul.f32 %v4024_v21, %v4024_v21 }
 0x1b5   :  { %2737 = vmatmul.msk.f32.gmra.mxu3 %vm1228_vm0, %v1259_v22  ;;  %v1377_v22 = vld [vmem:[%s4464_s4 + $0x50] sm:$0xff] }
 0x1b6   :  { %1530 = vmatpush.msra.mxu0 %v1377_v22 }
 0x1bb   :  { %2738 = vmatmul.msk.f32.vlgmr.msrb.gmra.mxu2 %vm1228_vm0, %v1327_v23  ;;  %v1378_v23 = vld [vmem:[%s4464_s4 + $0x58] sm:$0xff] }
 0x1bc   :  { %1553 = vmatpush.msra.mxu3 %v1378_v23  ;;  %v1394_v23 = vld [vmem:[%s4463_s3 + $0x1e8] sm:$0xff] }
 0x1be   :  { %1554 = vmatpush.msra.mxu3 %v1376_v25  ;;  %v1393_v25 = vld [vmem:[%s4463_s3 + $0x1e0] sm:$0xff] }
 0x1c3   :  { %2739 = vmatmul.msk.f32.gmra.mxu2 %vm1228_vm0, %v1328_v24  ;;  %v1375_v24 = vld [vmem:[%s4464_s4 + $0x40] sm:$0xff] }
 0x1c4   :  { %1531 = vmatpush.msra.mxu0 %v1375_v24  ;;  %v1410_v24 = vld [vmem:[%s4463_s3 + $0x268] sm:$0xff] }
 0x1c6   :  { %1532 = vmatpush.msra.mxu0 %v1373_v27 }
 0x228   :  { %v1252_v28 = vpop.f32.mrf.mxu0 }
 0x229   :  { %v1289_v30 = vmul.f32 %v1252_v28, %v1252_v28  ;;  %v1293_v49 = vsub.f32 %v1219_v16, %v1252_v28  ;;  %v1374_v28 = vld [vmem:[%s4464_s4 + $0x38] sm:$0xff] }
 0x22a   :  { %1555 = vmatpush.msra.mxu3 %v1374_v28  ;;  %v1409_v28 = vld [vmem:[%s4463_s3 + $0x260] sm:$0xff] }
 0x230   :  { %v1283_v31 = vpop.f32.mrf.mxu3 }
 0x231   :  { %v1291_v32 = vsub.f32 %v1283_v31, %v1289_v30  ;;  %v1371_v30 = vld [vmem:[%s4464_s4 + $0x20] sm:$0xff]  ;;  %v1372_v31 = vld [vmem:[%s4464_s4 + $0x28] sm:$0xff] }
 0x232   :  { %1533 = vmatpush.msra.mxu0 %v1371_v30  ;;  %1556 = vmatpush.msra.mxu3 %v1372_v31  ;;  %v1408_v30 = vld [vmem:[%s4463_s3 + $0x258] sm:$0xff] }
 0x233   :  { %v1295_v33 = vadd.f32 1e-05, %v1291_v32 }
 0x235   :  { %2940 = vrsqrt.f32 %v1295_v33  ;;  %vm1303_vm4 = vweird.f32 %v1295_v33 }
 0x236   :  { %v1255_v34 = vpop.f32.mrf.mxu2 }
 0x237   :  { %v1290_v35 = vmul.f32 %v1255_v34, %v1255_v34  ;;  %v1294_v0 = vsub.f32 %v4024_v21, %v1255_v34 }
 0x238   :  { %v1286_v36 = vpop.f32.mrf.mxu3 }
 0x239   :  { %v1292_v37 = vsub.f32 %v1286_v36, %v1290_v35 }
 0x23b   :  { %v2941_v38 = vpop.eup %2940  ;;  %v1296_v1 = vadd.f32 1e-05, %v1292_v37 }
 0x23c   :  { %v1298_v41 = vmul.f32 %v2941_v38, %v1295_v33  ;;  %vm1304_vm3 = vweird.f32 %v2941_v38 }
 0x23d   :  { %2942 = vrsqrt.f32 %v1296_v1  ;;  %vm1305_vm5 = vmor %vm1303_vm4, %vm1304_vm3  ;;  %vm1313_vm7 = vweird.f32 %v1296_v1 }
 0x23e   :  { %v1299_v42 = vmul.f32 %v2941_v38, %v1298_v41  ;;  %v1358_v45 = vpop.f32.mrf.mxu2 }
 0x23f   :  { %v1359_v58 = vadd.f32 %v2918_v40, %v1358_v45 }
 0x240   :  { %v1300_v17 = vmul.f32 0.5, %v1299_v42 }
 0x241   :  { %v1836_v10 = vsel %vm1835_vm1, %v1359_v58, -inf  ;;  %v1415_v48 = vsel %vm1414_vm2, %v1359_v58, -inf }
 0x242   :  { %v1301_v39 = vsub.f32 1.5, %v1300_v17  ;;  %1837 = vmax.xlane.f32.xlu2 %v1836_v10  ;;  %1416 = vmax.xlane.f32.xlu0 %v1415_v48 }
 0x243   :  { %v2943_v43 = vpop.eup %2942 }
 0x244   :  { %v1302_v44 = vmul.f32 %v2941_v38, %v1301_v39  ;;  %v1308_v47 = vmul.f32 %v2943_v43, %v1296_v1  ;;  %vm1314_vm6 = vweird.f32 %v2943_v43  ;;  %v4115_v1 = vld [vmem:[%s4464_s4 + $0x10] sm:$0xff] }
 0x245   :  { %vm1315_vm8 = vmor %vm1313_vm7, %vm1314_vm6  ;;  %1665 = vmatpush.msra.mxu2 %v4115_v1 }
 0x246   :  { %v1306_v51 = vsel %vm1305_vm5, %v2941_v38, %v1302_v44  ;;  %v1309_v52 = vmul.f32 %v2943_v43, %v1308_v47  ;;  %v1361_v53 = vpop.f32.mrf.mxu2 }
 0x247   :  { %v1317_v54 = vmul.f32 %v1306_v51, %v1293_v49  ;;  %v4059_v55 = vadd.f32 %v2918_v40, %v1361_v53  ;;  %v4120_v40 = vld [vmem:[%s4464_s4 + $0x18] sm:$0xff] }
 0x248   :  { %v1310_v57 = vmul.f32 0.5, %v1309_v52 }
 0x249   :  { %v1321_v59 = vmul.f32 %v2917_v50, %v1317_v54  ;;  %v1839_v60 = vsel %vm1835_vm1, %v4059_v55, -inf  ;;  %v1418_v61 = vsel %vm1414_vm2, %v4059_v55, -inf }
 0x24a   :  { %v1311_v62 = vsub.f32 1.5, %v1310_v57  ;;  %1840 = vmax.xlane.f32.xlu2 %v1839_v60  ;;  %1419 = vmax.xlane.f32.xlu0 %v1418_v61 }
 0x24b   :  { %v1325_v63 = vadd.f32 %v2919_v56, %v1321_v59 }
 0x24c   :  { %v1312_v46 = vmul.f32 %v2943_v43, %v1311_v62 }
 0x24d   :  { %2741 = vmatmul.msk.f32.vlgmr.msrb.gmra.mxu3 %vm1228_vm0, %v1325_v63 }
 0x24e   :  { %v1316_v2 = vsel %vm1315_vm8, %v2943_v43, %v1312_v46  ;;  %1688 = vmatpush.msrb.mxu3 %v4120_v40 }
 0x24f   :  { %v1318_v3 = vmul.f32 %v1316_v2, %v1294_v0 }
 0x251   :  { %v1322_v4 = vmul.f32 %v2917_v50, %v1318_v3 }
 0x253   :  { %v1326_v5 = vadd.f32 %v2919_v56, %v1322_v4 }
 0x255   :  { %2742 = vmatmul.msk.f32.gmra.mxu3 %vm1228_vm0, %v1326_v5 }
 0x2b5   :  { %v1838_v6 = vpop.xlane.xlu2 %1837  ;;  %v1417_v7 = vpop.xlane.xlu0 %1416 }
 0x2b6   :  { %v1842_v8 = vsub.f32 %v1359_v58, %v1838_v6  ;;  %v1421_v9 = vsub.f32 %v1359_v58, %v1417_v7 }
 0x2b8   :  { %v1844_v11 = vmul.f32 1.442695, %v1842_v8  ;;  %v1423_v12 = vmul.f32 1.442695, %v1421_v9 }
 0x2ba   :  { %2944 = vpow2.f32 %v1844_v11 }
 0x2bb   :  { %2946 = vpow2.f32 %v1423_v12 }
 0x2bd   :  { %v1420_v13 = vpop.xlane.xlu0 %1419  ;;  %v1841_v32 = vpop.xlane.xlu2 %1840 }
 0x2be   :  { %v1422_v14 = vsub.f32 %v4059_v55, %v1420_v13  ;;  %v1843_v35 = vsub.f32 %v4059_v55, %v1841_v32  ;;  %v1391_v32 = vld [vmem:[%s4463_s3 + $0x1d0] sm:$0xff] }
 0x2c0   :  { %v4072_v15 = vpop.eup %2944  ;;  %v1425_v16 = vmul.f32 1.442695, %v1422_v14  ;;  %v1846_v36 = vmul.f32 1.442695, %v1843_v35  ;;  %v1396_v14 = vld [vmem:[%s4463_s3 + $0x1f8] sm:$0xff]  ;;  %v1390_v35 = vld [vmem:[%s4463_s3 + $0x1c8] sm:$0xff] }
 0x2c1   :  { %v4074_v18 = vpop.eup %2946  ;;  %1850 = vrot.lane.b32.xlu0 %v4072_v15, %s3016_s19  ;;  %1701 = vmatpush.msrb.mxu0 %v1396_v14 }
 0x2c2   :  { %v1427_v19 = vsel %vm1414_vm2, %v4074_v18, 0.0  ;;  %2948 = vpow2.f32 %v1425_v16  ;;  %v1412_v16 = vld [vmem:[%s4463_s3 + $0x278] sm:$0xff] }
 0x2c3   :  { %1428 = vadd.xlane.f32.xlu1 %v1427_v19  ;;  %1724 = vmatpush.msrb.mxu1 %v1412_v16  ;;  %v1411_v19 = vld [vmem:[%s4463_s3 + $0x270] sm:$0xff] }
 0x2c5   :  { %1725 = vmatpush.msrb.mxu1 %v1411_v19 }
 0x2c7   :  { %1726 = vmatpush.msrb.mxu1 %v1410_v24 }
 0x2c8   :  { %v4080_v20 = vpop.eup %2948 }
 0x2c9   :  { %v1430_v21 = vsel %vm1414_vm2, %v4080_v20, 0.0  ;;  %1727 = vmatpush.msrb.mxu1 %v1409_v28 }
 0x2cb   :  { %1431 = vadd.xlane.f32.xlu1 %v1430_v21  ;;  %1728 = vmatpush.msrb.mxu1 %v1408_v30 }
 0x2d0   :  { %v1461_v29 = vpop.f32.mrf.mxu3 }
 0x2d1   :  { %v1462_v33 = vadd.f32 %v2920_v26, %v1461_v29  ;;  %v1392_v29 = vld [vmem:[%s4463_s3 + $0x1d8] sm:$0xff] }
 0x2d3   :  { %v2743_v34 = vmul.f32 -1.442695, %v1462_v33 }
 0x2d5   :  { %2950 = vpow2.f32 %v2743_v34 }
 0x2d6   :  { %2952 = vpow2.f32 %v1846_v36  ;;  %v1406_v36 = vld [vmem:[%s4463_s3 + $0x248] sm:$0xff] }
 0x2d8   :  { %v1464_v37 = vpop.f32.mrf.mxu3 }
 0x2d9   :  { %v1465_v38 = vadd.f32 %v2920_v26, %v1464_v37 }
 0x2db   :  { %v2951_v41 = vpop.eup %2950  ;;  %v2744_v42 = vmul.f32 -1.442695, %v1465_v38 }
 0x2dc   :  { %v1473_v45 = vadd.f32 1.0, %v2951_v41  ;;  %v4124_v58 = vpop.eup %2952  ;;  %v1389_v41 = vld [vmem:[%s4463_s3 + $0x1c0] sm:$0xff] }
 0x2dd   :  { %2954 = vpow2.f32 %v2744_v42  ;;  %v1405_v42 = vld [vmem:[%s4463_s3 + $0x240] sm:$0xff] }
 0x2de   :  { %2956 = vrcp.f32 %v1473_v45  ;;  %v1486_v44 = vand.u32 2147483648, %v1473_v45  ;;  %v1484_v49 = vand.u32 2147483647, %v1473_v45  ;;  %vm1480_vm10 = vweird.f32 %v1473_v45 }
 0x2e0   :  { %v1487_v52 = vor.u32 1.1754944e-38, %v1486_v44  ;;  %vm1485_vm12 = vcmp.eq.f32.partialorder %v1484_v49, 8.507059e+37  ;;  %v1386_v49 = vld [vmem:[%s4463_s3 + $0x1a8] sm:$0xff] }
 0x2e3   :  { %v2955_v17 = vpop.eup %2954 }
 0x2e4   :  { %v2957_v10 = vpop.eup %2956  ;;  %v1474_v48 = vadd.f32 1.0, %v2955_v17  ;;  %1852 = vrot.lane.b32.xlu1 %v4124_v58, %s3016_s19  ;;  %v1388_v17 = vld [vmem:[%s4463_s3 + $0x1b8] sm:$0xff] }
 0x2e5   :  { %v1476_v39 = vmul.f32 %v2957_v10, %v1473_v45  ;;  %vm1481_vm9 = vweird.f32 %v2957_v10 }
 0x2e6   :  { %2958 = vrcp.f32 %v1474_v48  ;;  %vm1482_vm11 = vmor %vm1480_vm10, %vm1481_vm9  ;;  %v1501_v59 = vand.u32 2147483648, %v1474_v48  ;;  %v1499_v61 = vand.u32 2147483647, %v1474_v48  ;;  %vm1495_vm14 = vweird.f32 %v1474_v48 }
 0x2e7   :  { %v1477_v43 = vsub.f32 1.0, %v1476_v39  ;;  %v1387_v39 = vld [vmem:[%s4463_s3 + $0x1b0] sm:$0xff] }
 0x2e8   :  { %v1502_v63 = vor.u32 1.1754944e-38, %v1501_v59  ;;  %vm1500_vm1 = vcmp.eq.f32.partialorder %v1499_v61, 8.507059e+37  ;;  %v1399_v61 = vld [vmem:[%s4463_s3 + $0x210] sm:$0xff] }
 0x2e9   :  { %v1478_v47 = vmul.f32 %v2957_v10, %v1477_v43  ;;  %v1403_v43 = vld [vmem:[%s4463_s3 + $0x230] sm:$0xff] }
 0x2eb   :  { %v1479_v50 = vadd.f32 %v2957_v10, %v1478_v47 }
 0x2ec   :  { %v2959_v51 = vpop.eup %2958 }
 0x2ed   :  { %v1483_v53 = vsel %vm1482_vm11, %v2957_v10, %v1479_v50  ;;  %v1491_v54 = vmul.f32 %v2959_v51, %v1474_v48  ;;  %vm1496_vm13 = vweird.f32 %v2959_v51  ;;  %v1404_v10 = vld [vmem:[%s4463_s3 + $0x238] sm:$0xff]  ;;  %v1402_v50 = vld [vmem:[%s4463_s3 + $0x228] sm:$0xff] }
 0x2ee   :  { %v1488_v55 = vsel %vm1485_vm12, %v1487_v52, %v1483_v53  ;;  %vm1497_vm15 = vmor %vm1495_vm14, %vm1496_vm13  ;;  %v1401_v52 = vld [vmem:[%s4463_s3 + $0x220] sm:$0xff] }
 0x2ef   :  { %v1505_v56 = vmul.f32 %v1488_v55, %v1462_v33  ;;  %v1492_v57 = vsub.f32 1.0, %v1491_v54  ;;  %v1407_v33 = vld [vmem:[%s4463_s3 + $0x250] sm:$0xff] }
 0x2f0   :  { %1729 = vmatpush.msrb.mxu1 %v1407_v33 }
 0x2f1   :  { %v1493_v60 = vmul.f32 %v2959_v51, %v1492_v57  ;;  %2745 = vmatmul.msk.f32.vlgmr.msra.gmra.mxu0 %vm1228_vm0, %v1505_v56  ;;  %2747 = vmatmul.msk.f32.vlgmr.msra.gmra.mxu3 %vm1228_vm0, %v1505_v56  ;;  %v1384_v56 = vld [vmem:[%s4463_s3 + $0x198] sm:$0xff] }
 0x2f2   :  { %1730 = vmatpush.msrb.mxu1 %v1406_v36  ;;  %v1400_v57 = vld [vmem:[%s4463_s3 + $0x218] sm:$0xff] }
 0x2f3   :  { %v1494_v62 = vadd.f32 %v2959_v51, %v1493_v60  ;;  %v1383_v60 = vld [vmem:[%s4463_s3 + $0x190] sm:$0xff] }
 0x2f4   :  { %1731 = vmatpush.msrb.mxu1 %v1405_v42 }
 0x2f5   :  { %v1498_v46 = vsel %vm1497_vm15, %v2959_v51, %v1494_v62  ;;  %v1385_v51 = vld [vmem:[%s4463_s3 + $0x1a0] sm:$0xff] }
 0x2f6   :  { %v1503_v0 = vsel %vm1500_vm1, %v1502_v63, %v1498_v46  ;;  %1732 = vmatpush.msrb.mxu1 %v1404_v10  ;;  %v1382_v46 = vld [vmem:[%s4463_s3 + $0x188] sm:$0xff] }
 0x2f7   :  { %v1506_v2 = vmul.f32 %v1503_v0, %v1465_v38  ;;  %v1398_v0 = vld [vmem:[%s4463_s3 + $0x208] sm:$0xff] }
 0x2f8   :  { %1733 = vmatpush.msrb.mxu1 %v1403_v43 }
 0x2f9   :  { %2746 = vmatmul.msk.f32.gmra.mxu0 %vm1228_vm0, %v1506_v2  ;;  %2748 = vmatmul.msk.f32.gmra.mxu3 %vm1228_vm0, %v1506_v2 }
 0x2fa   :  { %1734 = vmatpush.msrb.mxu1 %v1402_v50 }
 0x2fc   :  { %1735 = vmatpush.msrb.mxu1 %v1401_v52 }
 0x2fe   :  { %1736 = vmatpush.msrb.mxu1 %v1400_v57 }
 0x300   :  { %1737 = vmatpush.msrb.mxu1 %v1399_v61 }
 0x302   :  { %1738 = vmatpush.msrb.mxu1 %v1398_v0 }
 0x333   :  { %v1851_v3 = vpop.permute.xlu0 %1850 }
 0x334   :  { %v1856_v4 = vsel %vm1414_vm2, %v1851_v3, 0.0  ;;  %v1381_v3 = vld [vmem:[%s4463_s3 + $0x180] sm:$0xff] }
 0x335   :  { %1857 = vadd.xlane.f32.xlu2 %v1856_v4  ;;  %v1397_v4 = vld [vmem:[%s4463_s3 + $0x200] sm:$0xff] }
 0x336   :  { %v1429_v5 = vpop.xlane.xlu1 %1428  ;;  %1739 = vmatpush.msrb.mxu1 %v1397_v4 }
 0x337   :  { %2960 = vrcp.f32 %v1429_v5 }
 0x33d   :  { %v2961_v6 = vpop.eup %2960 }
 0x33e   :  { %v1435_v7 = vmul.f32 %v2961_v6, %v4074_v18  ;;  %v1432_v8 = vpop.xlane.xlu1 %1431  ;;  %v1395_v18 = vld [vmem:[%s4463_s3 + $0x1f0] sm:$0xff] }
 0x33f   :  { %2962 = vrcp.f32 %v1432_v8  ;;  %1702 = vmatpush.msrb.mxu0 %v1395_v18 }
 0x340   :  { %2753 = vmatmul.msk.f32.vlgmr.msra.gmra.mxu2 %vm1414_vm2, %v1435_v7  ;;  %2755 = vmatmul.msk.f32.vlgmr.msrb.gmra.mxu3 %vm1414_vm2, %v1435_v7 }
 0x341   :  { %1703 = vmatpush.msrb.mxu0 %v1394_v23 }
 0x343   :  { %1704 = vmatpush.msrb.mxu0 %v1393_v25 }
 0x345   :  { %v2963_v9 = vpop.eup %2962  ;;  %1705 = vmatpush.msrb.mxu0 %v1392_v29 }
 0x346   :  { %v1436_v11 = vmul.f32 %v2963_v9, %v4080_v20  ;;  %v2740_v20 = vld [vmem:[%s4464_s4 + $0x60] ss:$8 sm:$0x3] }
 0x347   :  { %v1508_v21 = vperm.slane %v2740_v20, 0  ;;  %v1509_v26 = vperm.slane %v2740_v20, 1  ;;  %1706 = vmatpush.msrb.mxu0 %v1391_v32 }
 0x348   :  { %2754 = vmatmul.msk.f32.gmra.mxu2 %vm1414_vm2, %v1436_v11  ;;  %2756 = vmatmul.msk.f32.gmra.mxu3 %vm1414_vm2, %v1436_v11 }
 0x349   :  { %1707 = vmatpush.msrb.mxu0 %v1390_v35 }
 0x34b   :  { %1708 = vmatpush.msrb.mxu0 %v1389_v41 }
 0x34d   :  { %1709 = vmatpush.msrb.mxu0 %v1388_v17 }
 0x34f   :  { %1710 = vmatpush.msrb.mxu0 %v1387_v39 }
 0x351   :  { %1711 = vmatpush.msrb.mxu0 %v1386_v49 }
 0x353   :  { %1712 = vmatpush.msrb.mxu0 %v1385_v51 }
 0x355   :  { %1713 = vmatpush.msrb.mxu0 %v1384_v56 }
 0x356   :  { %v1853_v12 = vpop.permute.xlu1 %1852 }
 0x357   :  { %v1859_v13 = vsel %vm1414_vm2, %v1853_v12, 0.0  ;;  %1714 = vmatpush.msrb.mxu0 %v1383_v60 }
 0x358   :  { %1860 = vadd.xlane.f32.xlu2 %v1859_v13 }
 0x359   :  { %1715 = vmatpush.msrb.mxu0 %v1382_v46 }
 0x35b   :  { %1716 = vmatpush.msrb.mxu0 %v1381_v3 }
 0x35d   :  { %2121 = vmatpush.msra.mxu0 %v4120_v40 }
 0x36e   :  { %v1535_v22 = vpop.f32.mrf.mxu0 }
 0x36f   :  { %v4173_v31 = vadd.f32 %v1535_v22, %v1508_v21 }
 0x371   :  { %v2749_v37 = vmul.f32 -1.442695, %v4173_v31 }
 0x373   :  { %2964 = vpow2.f32 %v2749_v37 }
 0x374   :  { %v1558_v27 = vpop.f32.mrf.mxu3 }
 0x375   :  { %v4181_v34 = vadd.f32 %v1558_v27, %v1509_v26 }
 0x376   :  { %v1538_v45 = vpop.f32.mrf.mxu0 }
 0x377   :  { %v2750_v38 = vmul.f32 -1.442695, %v4181_v34  ;;  %v4209_v44 = vadd.f32 %v1538_v45, %v1508_v21 }
 0x379   :  { %2966 = vpow2.f32 %v2750_v38  ;;  %v2751_v53 = vmul.f32 -1.442695, %v4209_v44  ;;  %v2965_v54 = vpop.eup %2964 }
 0x37a   :  { %v1576_v62 = vadd.f32 1.0, %v2965_v54 }
 0x37b   :  { %2968 = vpow2.f32 %v2751_v53 }
 0x37c   :  { %v1561_v48 = vpop.f32.mrf.mxu3  ;;  %vm1585_vm5 = vweird.f32 %v1576_v62  ;;  %v1591_v28 = vand.u32 2147483648, %v1576_v62  ;;  %v1589_v30 = vand.u32 2147483647, %v1576_v62 }
 0x37d   :  { %v4211_v47 = vadd.f32 %v1561_v48, %v1509_v26 }
 0x37e   :  { %v1592_v37 = vor.u32 1.1754944e-38, %v1591_v28  ;;  %vm1590_vm9 = vcmp.eq.f32.partialorder %v1589_v30, 8.507059e+37 }
 0x37f   :  { %v2752_v55 = vmul.f32 -1.442695, %v4211_v47  ;;  %v2967_v59 = vpop.eup %2966 }
 0x380   :  { %v1577_v63 = vadd.f32 1.0, %v2967_v59 }
 0x381   :  { %2970 = vpow2.f32 %v2752_v55  ;;  %v2969_v2 = vpop.eup %2968 }
 0x382   :  { %2972 = vrcp.f32 %v1576_v62  ;;  %v4251_v6 = vadd.f32 1.0, %v2969_v2  ;;  %vm1600_vm7 = vweird.f32 %v1577_v63  ;;  %v1604_v32 = vand.u32 2147483647, %v1577_v63 }
 0x383   :  { %2974 = vrcp.f32 %v1577_v63 }
 0x384   :  { %vm1605_vm10 = vcmp.eq.f32.partialorder %v1604_v32, 8.507059e+37  ;;  %vm1615_vm12 = vweird.f32 %v4251_v6  ;;  %v1621_v10 = vand.u32 2147483648, %v4251_v6  ;;  %v1619_v49 = vand.u32 2147483647, %v4251_v6 }
 0x386   :  { %v1622_v57 = vor.u32 1.1754944e-38, %v1621_v10 }
 0x387   :  { %v2971_v5 = vpop.eup %2970 }
 0x388   :  { %v2973_v7 = vpop.eup %2972  ;;  %v4254_v8 = vadd.f32 1.0, %v2971_v5 }
 0x389   :  { %v2975_v11 = vpop.eup %2974  ;;  %v1581_v12 = vmul.f32 %v2973_v7, %v1576_v62  ;;  %vm1586_vm3 = vweird.f32 %v2973_v7 }
 0x38a   :  { %v1596_v13 = vmul.f32 %v2975_v11, %v1577_v63  ;;  %vm1601_vm4 = vweird.f32 %v2975_v11  ;;  %vm1587_vm6 = vmor %vm1585_vm5, %vm1586_vm3  ;;  %v1636_v50 = vand.u32 2147483648, %v4254_v8  ;;  %vm1630_vm15 = vweird.f32 %v4254_v8 }
 0x38b   :  { %v1582_v18 = vsub.f32 1.0, %v1581_v12  ;;  %vm1602_vm8 = vmor %vm1600_vm7, %vm1601_vm4  ;;  %v1634_v53 = vand.u32 2147483647, %v4254_v8  ;;  %vm1620_vm3 = vcmp.eq.f32.partialorder %v1619_v49, 8.507059e+37 }
 0x38c   :  { %v1597_v19 = vsub.f32 1.0, %v1596_v13 }
 0x38d   :  { %v1583_v40 = vmul.f32 %v2973_v7, %v1582_v18  ;;  %vm1635_vm4 = vcmp.eq.f32.partialorder %v1634_v53, 8.507059e+37  ;;  %v2922_v53 = vld [vmem:[%s4463_s3 + $0x2a8] ss:$0 sm:$0xff] }
 0x38e   :  { %v1598_v22 = vmul.f32 %v2975_v11, %v1597_v19 }
 0x38f   :  { %v1584_v25 = vadd.f32 %v2973_v7, %v1583_v40 }
 0x390   :  { %v1599_v26 = vadd.f32 %v2975_v11, %v1598_v22 }
 0x391   :  { %v1588_v33 = vsel %vm1587_vm6, %v2973_v7, %v1584_v25 }
 0x392   :  { %v1603_v35 = vsel %vm1602_vm8, %v2975_v11, %v1599_v26  ;;  %v1593_v42 = vsel %vm1590_vm9, %v1592_v37, %v1588_v33  ;;  %v1788_v11 = vld [vmem:[%s4463_s3 + $0x290] sm:$0xff] }
 0x393   :  { %v1640_v39 = vmul.f32 %v1593_v42, %v4173_v31  ;;  %v1637_v31 = vor.u32 1.1754944e-38, %v1636_v50 }
 0x3a8   :  { %v1858_v9 = vpop.xlane.xlu2 %1857 }
 0x3a9   :  { %2976 = vrcp.f32 %v1858_v9 }
 0x3aa   :  { %2978 = vrcp.f32 %v4251_v6 }
 0x3ab   :  { %2980 = vrcp.f32 %v4254_v8 }
 0x3af   :  { %v2977_v14 = vpop.eup %2976 }
 0x3b0   :  { %v1864_v16 = vmul.f32 %v2977_v14, %v4072_v15  ;;  %v2979_v20 = vpop.eup %2978  ;;  %v1606_v15 = vand.u32 2147483648, %v1577_v63  ;;  %v1787_v14 = vld [vmem:[%s4463_s3 + $0x288] sm:$0xff] }
 0x3b1   :  { %v2981_v21 = vpop.eup %2980  ;;  %v1611_v23 = vmul.f32 %v2979_v20, %v4251_v6  ;;  %vm1616_vm11 = vweird.f32 %v2979_v20 }
 0x3b2   :  { %2075 = vrot.lane.b32.xlu2 %v1864_v16, %s3016_s19  ;;  %v1626_v24 = vmul.f32 %v2981_v21, %v4254_v8  ;;  %v1607_v38 = vor.u32 1.1754944e-38, %v1606_v15  ;;  %vm1631_vm13 = vweird.f32 %v2981_v21  ;;  %vm1617_vm14 = vmor %vm1615_vm12, %vm1616_vm11 }
 0x3b3   :  { %v1612_v27 = vsub.f32 1.0, %v1611_v23  ;;  %vm1632_vm1 = vmor %vm1630_vm15, %vm1631_vm13 }
 0x3b4   :  { %v1627_v29 = vsub.f32 1.0, %v1626_v24  ;;  %v1608_v45 = vsel %vm1605_vm10, %v1607_v38, %v1603_v35 }
 0x3b5   :  { %v1613_v36 = vmul.f32 %v2979_v20, %v1612_v27  ;;  %v1641_v43 = vmul.f32 %v1608_v45, %v4181_v34 }
 0x3b6   :  { %v1628_v41 = vmul.f32 %v2981_v21, %v1627_v29 }
 0x3b7   :  { %v1614_v17 = vadd.f32 %v2979_v20, %v1613_v36 }
 0x3b8   :  { %v1629_v48 = vadd.f32 %v2981_v21, %v1628_v41 }
 0x3b9   :  { %v1618_v56 = vsel %vm1617_vm14, %v2979_v20, %v1614_v17 }
 0x3ba   :  { %v1633_v59 = vsel %vm1632_vm1, %v2981_v21, %v1629_v48  ;;  %v1623_v34 = vsel %vm1620_vm3, %v1622_v57, %v1618_v56  ;;  %v1795_v57 = vld [vmem:[%s4464_s4 + $0x88] sm:$0xff] }
 0x3bb   :  { %v1638_v60 = vsel %vm1635_vm4, %v1637_v31, %v1633_v59  ;;  %v1642_v61 = vmul.f32 %v1623_v34, %v4209_v44  ;;  %v2921_v44 = vld [vmem:[%s4463_s3 + $0x280] ss:$0 sm:$0xff]  ;;  %v1793_v34 = vld [vmem:[%s4464_s4 + $0x78] sm:$0xff] }
 0x3bc   :  { %v1643_v46 = vmul.f32 %v1638_v60, %v4211_v47  ;;  %v1790_v47 = vld [vmem:[%s4463_s3 + $0x2a0] sm:$0xff]  ;;  %v1792_v60 = vld [vmem:[%s4464_s4 + $0x70] sm:$0xff] }
 0x3bd   :  { %1885 = vmatpush.msrb.mxu2 %v1790_v47  ;;  %v1794_v59 = vld [vmem:[%s4464_s4 + $0x80] sm:$0xff] }
 0x3c3   :  { %v1667_v51 = vpop.f32.mrf.mxu2  ;;  %v1690_v52 = vpop.f32.mrf.mxu3 }
 0x3c4   :  { %v1696_v54 = vmul.f32 %v1667_v51, %v1640_v39  ;;  %v1697_v55 = vmul.f32 %v1690_v52, %v1641_v43  ;;  %v1799_v51 = vld [vmem:[%s4464_s4 + $0xa8] sm:$0xff]  ;;  %v1798_v52 = vld [vmem:[%s4464_s4 + $0xa0] sm:$0xff] }
 0x3c5   :  { %1959 = vmatpush.msra.mxu3 %v1798_v52  ;;  %v1822_v52 = vld [vmem:[%s4463_s3 + $0x350] sm:$0xff] }
 0x3c6   :  { %1717 = vmatmul.f32.vlgmr.msrb.gmra.mxu0 %v1696_v54  ;;  %1740 = vmatmul.f32.vlgmr.msrb.gmra.mxu1 %v1697_v55  ;;  %v1797_v54 = vld [vmem:[%s4464_s4 + $0x98] sm:$0xff]  ;;  %v1796_v55 = vld [vmem:[%s4464_s4 + $0x90] sm:$0xff] }
 0x3c7   :  { %1960 = vmatpush.msra.mxu3 %v1796_v55  ;;  %v1805_v55 = vld [vmem:[%s4463_s3 + $0x2c8] sm:$0xff] }
 0x3c9   :  { %1961 = vmatpush.msra.mxu3 %v1794_v59 }
 0x3cb   :  { %v1670_v62 = vpop.f32.mrf.mxu2  ;;  %v1861_v63 = vpop.xlane.xlu2 %1860  ;;  %1962 = vmatpush.msra.mxu3 %v1792_v60 }
 0x3cc   :  { %v1698_v0 = vmul.f32 %v1670_v62, %v1642_v61  ;;  %2982 = vrcp.f32 %v1861_v63  ;;  %v1693_v2 = vpop.f32.mrf.mxu3 }
 0x3cd   :  { %v1699_v3 = vmul.f32 %v1693_v2, %v1643_v46  ;;  %2098 = vmatpush.msrb.mxu3 %v4115_v1 }
 0x3ce   :  { %1720 = vmatmul.f32.gmra.mxu0 %v1698_v0 }
 0x3cf   :  { %1743 = vmatmul.f32.gmra.mxu1 %v1699_v3 }
 0x3d2   :  { %v2983_v4 = vpop.eup %2982 }
 0x3d3   :  { %v1865_v5 = vmul.f32 %v2983_v4, %v4124_v58  ;;  %v1789_v58 = vld [vmem:[%s4463_s3 + $0x298] sm:$0xff] }
 0x3d4   :  { %1886 = vmatpush.msrb.mxu2 %v1789_v58 }
 0x3d5   :  { %2077 = vrot.lane.b32.xlu0 %v1865_v5, %s3016_s19 }
 0x3d6   :  { %1887 = vmatpush.msrb.mxu2 %v1788_v11 }
 0x3d8   :  { %1888 = vmatpush.msrb.mxu2 %v1787_v14 }
 0x3da   :  { %1982 = vmatpush.msra.mxu2 %v1799_v51  ;;  %v1806_v51 = vld [vmem:[%s4463_s3 + $0x2d0] sm:$0xff] }
 0x3dc   :  { %1983 = vmatpush.msra.mxu2 %v1797_v54 }
 0x3de   :  { %1984 = vmatpush.msra.mxu2 %v1795_v57 }
 0x3e0   :  { %1985 = vmatpush.msra.mxu2 %v1793_v34  ;;  %v1820_v34 = vld [vmem:[%s4463_s3 + $0x340] sm:$0xff] }
 0x40c   :  { %v4274_v6 = vpop.permute.xlu2 %2075 }
 0x40d   :  { %2774 = vmatmul.msk.f32.vlgmr.msra.gmra.mxu0 %vm1414_vm2, %v4274_v6 }
 0x443   :  { %v1718_v7 = vpop.f32.mrf.mxu0  ;;  %v1741_v8 = vpop.f32.mrf.mxu1 }
 0x444   :  { %v1719_v9 = vadd.f32 %v2921_v44, %v1718_v7 }
 0x446   :  { %v1742_v12 = vadd.f32 %v1741_v8, %v1719_v9 }
 0x447   :  { %v4290_v13 = vpop.permute.xlu0 %2077 }
 0x448   :  { %v2757_v16 = vmul.f32 -1.442695, %v1742_v12  ;;  %2775 = vmatmul.msk.f32.gmra.mxu0 %vm1414_vm2, %v4290_v13 }
 0x44a   :  { %2984 = vpow2.f32 %v2757_v16 }
 0x44b   :  { %v1721_v18 = vpop.f32.mrf.mxu0 }
 0x44c   :  { %v1722_v19 = vadd.f32 %v2921_v44, %v1721_v18  ;;  %v1744_v20 = vpop.f32.mrf.mxu1 }
 0x44e   :  { %v1745_v21 = vadd.f32 %v1744_v20, %v1722_v19 }
 0x450   :  { %v2985_v40 = vpop.eup %2984  ;;  %v2758_v22 = vmul.f32 -1.442695, %v1745_v21 }
 0x451   :  { %v1753_v23 = vadd.f32 1.0, %v2985_v40 }
 0x452   :  { %2986 = vpow2.f32 %v2758_v22 }
 0x453   :  { %2988 = vrcp.f32 %v1753_v23  ;;  %v1766_v15 = vand.u32 2147483648, %v1753_v23  ;;  %v1764_v30 = vand.u32 2147483647, %v1753_v23  ;;  %vm1760_vm6 = vweird.f32 %v1753_v23 }
 0x455   :  { %v1767_v35 = vor.u32 1.1754944e-38, %v1766_v15  ;;  %vm1765_vm8 = vcmp.eq.f32.partialorder %v1764_v30, 8.507059e+37  ;;  %v1816_v15 = vld [vmem:[%s4463_s3 + $0x320] sm:$0xff]  ;;  %v1814_v30 = vld [vmem:[%s4463_s3 + $0x310] sm:$0xff] }
 0x458   :  { %v2987_v24 = vpop.eup %2986 }
 0x459   :  { %v2989_v25 = vpop.eup %2988  ;;  %v1754_v26 = vadd.f32 1.0, %v2987_v24 }
 0x45a   :  { %v1756_v27 = vmul.f32 %v2989_v25, %v1753_v23  ;;  %vm1761_vm5 = vweird.f32 %v2989_v25 }
 0x45b   :  { %2990 = vrcp.f32 %v1754_v26  ;;  %vm1762_vm7 = vmor %vm1760_vm6, %vm1761_vm5  ;;  %v1781_v45 = vand.u32 2147483648, %v1754_v26  ;;  %v1779_v10 = vand.u32 2147483647, %v1754_v26  ;;  %vm1775_vm10 = vweird.f32 %v1754_v26 }
 0x45c   :  { %v1757_v28 = vsub.f32 1.0, %v1756_v27  ;;  %v1817_v27 = vld [vmem:[%s4463_s3 + $0x328] sm:$0xff] }
 0x45d   :  { %v1782_v39 = vor.u32 1.1754944e-38, %v1781_v45  ;;  %vm1780_vm12 = vcmp.eq.f32.partialorder %v1779_v10, 8.507059e+37  ;;  %2134 = vmatpush.msra.mxu1 %v1817_v27  ;;  %v1826_v45 = vld [vmem:[%s4463_s3 + $0x370] sm:$0xff]  ;;  %v1825_v10 = vld [vmem:[%s4463_s3 + $0x368] sm:$0xff] }
 0x45e   :  { %v1758_v29 = vmul.f32 %v2989_v25, %v1757_v28  ;;  %v1833_v28 = vld [vmem:[%s4463_s3 + $0x3a8] sm:$0xff] }
 0x45f   :  { %2135 = vmatpush.msra.mxu1 %v1816_v15 }
 0x460   :  { %v1759_v32 = vadd.f32 %v2989_v25, %v1758_v29  ;;  %v1831_v29 = vld [vmem:[%s4463_s3 + $0x398] sm:$0xff] }
 0x461   :  { %v2991_v33 = vpop.eup %2990 }
 0x462   :  { %v1763_v36 = vsel %vm1762_vm7, %v2989_v25, %v1759_v32  ;;  %v1771_v37 = vmul.f32 %v2991_v33, %v1754_v26  ;;  %vm1776_vm9 = vweird.f32 %v2991_v33  ;;  %v1830_v32 = vld [vmem:[%s4463_s3 + $0x390] sm:$0xff] }
 0x463   :  { %v1768_v38 = vsel %vm1765_vm8, %v1767_v35, %v1763_v36  ;;  %vm1777_vm11 = vmor %vm1775_vm10, %vm1776_vm9  ;;  %v1829_v35 = vld [vmem:[%s4463_s3 + $0x388] sm:$0xff]  ;;  %v1812_v36 = vld [vmem:[%s4463_s3 + $0x300] sm:$0xff] }
 0x464   :  { %v1785_v41 = vmul.f32 %v1768_v38, %v1742_v12  ;;  %v1772_v42 = vsub.f32 1.0, %v1771_v37  ;;  %v1828_v37 = vld [vmem:[%s4463_s3 + $0x380] sm:$0xff]  ;;  %v1811_v38 = vld [vmem:[%s4463_s3 + $0x2f8] sm:$0xff] }
 0x466   :  { %v1773_v17 = vmul.f32 %v2991_v33, %v1772_v42  ;;  %2760 = vmatmul.msk.f32.vlgmr.msrb.gmra.mxu2 %vm1228_vm0, %v1785_v41  ;;  %v1827_v41 = vld [vmem:[%s4463_s3 + $0x378] sm:$0xff]  ;;  %v1810_v42 = vld [vmem:[%s4463_s3 + $0x2f0] sm:$0xff] }
 0x467   :  { %2157 = vmatpush.msrb.mxu2 %v1833_v28 }
 0x468   :  { %v1774_v48 = vadd.f32 %v2991_v33, %v1773_v17  ;;  %v1809_v17 = vld [vmem:[%s4463_s3 + $0x2e8] sm:$0xff] }
 0x46a   :  { %v1778_v43 = vsel %vm1777_vm11, %v2991_v33, %v1774_v48  ;;  %v1813_v33 = vld [vmem:[%s4463_s3 + $0x308] sm:$0xff]  ;;  %v1808_v48 = vld [vmem:[%s4463_s3 + $0x2e0] sm:$0xff] }
 0x46b   :  { %v1783_v49 = vsel %vm1780_vm12, %v1782_v39, %v1778_v43  ;;  %v1824_v39 = vld [vmem:[%s4463_s3 + $0x360] sm:$0xff]  ;;  %v2759_v43 = vld [vmem:[%s4464_s4 + $0xb0] ss:$8 sm:$0x3] }
 0x46c   :  { %v1786_v50 = vmul.f32 %v1783_v49, %v1745_v21  ;;  %v1807_v49 = vld [vmem:[%s4463_s3 + $0x2d8] sm:$0xff]  ;;  %v1938_v54 = vperm.slane %v2759_v43, 1 }
 0x46e   :  { %2761 = vmatmul.msk.f32.gmra.mxu2 %vm1228_vm0, %v1786_v50  ;;  %v1823_v50 = vld [vmem:[%s4463_s3 + $0x358] sm:$0xff] }
 0x4e9   :  { %v1890_v56 = vpop.f32.mrf.mxu2 }
 0x4ea   :  { %v1891_v31 = vadd.f32 %v2922_v53, %v1890_v56  ;;  %v1821_v56 = vld [vmem:[%s4463_s3 + $0x348] sm:$0xff] }
 0x4ec   :  { %v2762_v61 = vmul.f32 -1.442695, %v1891_v31 }
 0x4ee   :  { %2992 = vpow2.f32 %v2762_v61 }
 0x4f1   :  { %v1893_v62 = vpop.f32.mrf.mxu2 }
 0x4f2   :  { %v1894_v63 = vadd.f32 %v2922_v53, %v1893_v62  ;;  %v1937_v53 = vperm.slane %v2759_v43, 0  ;;  %v1803_v62 = vld [vmem:[%s4463_s3 + $0x2b8] sm:$0xff]  ;;  %v2123_v43 = vpop.f32.mrf.mxu0 }
 0x4f4   :  { %v2993_v46 = vpop.eup %2992  ;;  %v2763_v0 = vmul.f32 -1.442695, %v1894_v63 }
 0x4f5   :  { %v1902_v2 = vadd.f32 1.0, %v2993_v46 }
 0x4f6   :  { %2994 = vpow2.f32 %v2763_v0 }
 0x4f7   :  { %2996 = vrcp.f32 %v1902_v2  ;;  %v1915_v7 = vand.u32 2147483648, %v1902_v2  ;;  %v1913_v58 = vand.u32 2147483647, %v1902_v2  ;;  %vm1909_vm14 = vweird.f32 %v1902_v2 }
 0x4f9   :  { %v1916_v11 = vor.u32 1.1754944e-38, %v1915_v7  ;;  %vm1914_vm1 = vcmp.eq.f32.partialorder %v1913_v58, 8.507059e+37 }
 0x4fc   :  { %v2995_v3 = vpop.eup %2994 }
 0x4fd   :  { %v2997_v4 = vpop.eup %2996  ;;  %v1903_v5 = vadd.f32 1.0, %v2995_v3  ;;  %v1818_v3 = vld [vmem:[%s4463_s3 + $0x330] sm:$0xff] }
 0x4fe   :  { %v1905_v44 = vmul.f32 %v2997_v4, %v1902_v2  ;;  %vm1910_vm13 = vweird.f32 %v2997_v4  ;;  %v1802_v2 = vld [vmem:[%s4463_s3 + $0x2b0] sm:$0xff] }
 0x4ff   :  { %2998 = vrcp.f32 %v1903_v5  ;;  %vm1911_vm15 = vmor %vm1909_vm14, %vm1910_vm13  ;;  %v1930_v20 = vand.u32 2147483648, %v1903_v5  ;;  %v1928_v40 = vand.u32 2147483647, %v1903_v5  ;;  %vm1924_vm4 = vweird.f32 %v1903_v5 }
 0x500   :  { %v1906_v47 = vsub.f32 1.0, %v1905_v44 }
 0x501   :  { %v1931_v23 = vor.u32 1.1754944e-38, %v1930_v20  ;;  %vm1929_vm6 = vcmp.eq.f32.partialorder %v1928_v40, 8.507059e+37 }
 0x502   :  { %v1907_v8 = vmul.f32 %v2997_v4, %v1906_v47 }
 0x504   :  { %v1908_v9 = vadd.f32 %v2997_v4, %v1907_v8 }
 0x505   :  { %v2999_v1 = vpop.eup %2998 }
 0x506   :  { %v1912_v12 = vsel %vm1911_vm15, %v2997_v4, %v1908_v9  ;;  %v1920_v14 = vmul.f32 %v2999_v1, %v1903_v5  ;;  %vm1925_vm3 = vweird.f32 %v2999_v1 }
 0x507   :  { %v1917_v16 = vsel %vm1914_vm1, %v1916_v11, %v1912_v12  ;;  %vm1926_vm5 = vmor %vm1924_vm4, %vm1925_vm3 }
 0x508   :  { %v1934_v18 = vmul.f32 %v1917_v16, %v1891_v31  ;;  %v1921_v19 = vsub.f32 1.0, %v1920_v14  ;;  %v1804_v31 = vld [vmem:[%s4463_s3 + $0x2c0] sm:$0xff] }
 0x50a   :  { %v1922_v21 = vmul.f32 %v2999_v1, %v1921_v19  ;;  %2764 = vmatmul.msk.f32.vlgmr.msra.gmra.mxu3 %vm1228_vm0, %v1934_v18  ;;  %2766 = vmatmul.msk.f32.vlgmr.msra.gmra.mxu2 %vm1228_vm0, %v1934_v18 }
 0x50c   :  { %v1923_v22 = vadd.f32 %v2999_v1, %v1922_v21 }
 0x50e   :  { %v1927_v24 = vsel %vm1926_vm5, %v2999_v1, %v1923_v22 }
 0x50f   :  { %v1932_v25 = vsel %vm1929_vm6, %v1931_v23, %v1927_v24 }
 0x510   :  { %v1935_v26 = vmul.f32 %v1932_v25, %v1894_v63  ;;  %v1819_v63 = vld [vmem:[%s4463_s3 + $0x338] sm:$0xff] }
 0x512   :  { %2765 = vmatmul.msk.f32.gmra.mxu3 %vm1228_vm0, %v1935_v26  ;;  %2767 = vmatmul.msk.f32.gmra.mxu2 %vm1228_vm0, %v1935_v26 }
 0x51a   :  { %2772 = vmatmul.msk.f32.vlgmr.msrb.gmra.mxu3 %vm1414_vm2, %v4274_v6  ;;  %v1832_v6 = vld [vmem:[%s4463_s3 + $0x3a0] sm:$0xff] }
 0x51b   :  { %2158 = vmatpush.msrb.mxu2 %v1832_v6 }
 0x51d   :  { %2159 = vmatpush.msrb.mxu2 %v1831_v29 }
 0x51f   :  { %2160 = vmatpush.msrb.mxu2 %v1830_v32 }
 0x521   :  { %2161 = vmatpush.msrb.mxu2 %v1829_v35 }
 0x522   :  { %2773 = vmatmul.msk.f32.gmra.mxu3 %vm1414_vm2, %v4290_v13  ;;  %v1815_v13 = vld [vmem:[%s4463_s3 + $0x318] sm:$0xff] }
 0x523   :  { %2136 = vmatpush.msra.mxu1 %v1815_v13  ;;  %2162 = vmatpush.msrb.mxu2 %v1828_v37 }
 0x525   :  { %2137 = vmatpush.msra.mxu1 %v1814_v30  ;;  %2163 = vmatpush.msrb.mxu2 %v1827_v41 }
 0x527   :  { %2138 = vmatpush.msra.mxu1 %v1813_v33  ;;  %2164 = vmatpush.msrb.mxu2 %v1826_v45 }
 0x529   :  { %2139 = vmatpush.msra.mxu1 %v1812_v36  ;;  %2165 = vmatpush.msrb.mxu2 %v1825_v10 }
 0x52b   :  { %2140 = vmatpush.msra.mxu1 %v1811_v38  ;;  %2166 = vmatpush.msrb.mxu2 %v1824_v39 }
 0x52d   :  { %2141 = vmatpush.msra.mxu1 %v1810_v42  ;;  %2167 = vmatpush.msrb.mxu2 %v1823_v50 }
 0x52f   :  { %2142 = vmatpush.msra.mxu1 %v1809_v17  ;;  %2168 = vmatpush.msrb.mxu2 %v1822_v52 }
 0x531   :  { %2143 = vmatpush.msra.mxu1 %v1808_v48  ;;  %2169 = vmatpush.msrb.mxu2 %v1821_v56 }
 0x533   :  { %2144 = vmatpush.msra.mxu1 %v1807_v49  ;;  %2170 = vmatpush.msrb.mxu2 %v1820_v34 }
 0x535   :  { %2145 = vmatpush.msra.mxu1 %v1806_v51  ;;  %2171 = vmatpush.msrb.mxu2 %v1819_v63 }
 0x537   :  { %2146 = vmatpush.msra.mxu1 %v1805_v55  ;;  %2172 = vmatpush.msrb.mxu2 %v1818_v3 }
 0x539   :  { %2147 = vmatpush.msra.mxu1 %v1804_v31 }
 0x53b   :  { %2148 = vmatpush.msra.mxu1 %v1803_v62 }
 0x53d   :  { %2149 = vmatpush.msra.mxu1 %v1802_v2 }
 0x58d   :  { %v1964_v57 = vpop.f32.mrf.mxu3  ;;  %v1987_v59 = vpop.f32.mrf.mxu2 }
 0x58e   :  { %v4422_v60 = vadd.f32 %v1964_v57, %v1937_v53  ;;  %v4424_v61 = vadd.f32 %v1987_v59, %v1938_v54 }
 0x590   :  { %v2768_v46 = vmul.f32 -1.442695, %v4422_v60  ;;  %v2769_v0 = vmul.f32 -1.442695, %v4424_v61 }
 0x592   :  { %3000 = vpow2.f32 %v2768_v46 }
 0x593   :  { %3002 = vpow2.f32 %v2769_v0 }
 0x595   :  { %v1967_v4 = vpop.f32.mrf.mxu3  ;;  %v1990_v5 = vpop.f32.mrf.mxu2 }
 0x596   :  { %v4440_v44 = vadd.f32 %v1967_v4, %v1937_v53  ;;  %v4442_v47 = vadd.f32 %v1990_v5, %v1938_v54  ;;  %v2126_v4 = vpop.f32.mrf.mxu0 }
 0x598   :  { %v3001_v7 = vpop.eup %3000  ;;  %v2770_v8 = vmul.f32 -1.442695, %v4440_v44  ;;  %v2771_v1 = vmul.f32 -1.442695, %v4442_v47 }
 0x599   :  { %v3003_v58 = vpop.eup %3002  ;;  %v2005_v9 = vadd.f32 1.0, %v3001_v7  ;;  %v2923_v7 = vld [vmem:[%s4463_s3 + $0x3b0] ss:$0 sm:$0xff] }
 0x59a   :  { %v2006_v11 = vadd.f32 1.0, %v3003_v58  ;;  %3004 = vpow2.f32 %v2770_v8 }
 0x59b   :  { %3006 = vrcp.f32 %v2005_v9  ;;  %v2018_v24 = vand.u32 2147483647, %v2005_v9  ;;  %v2020_v26 = vand.u32 2147483648, %v2005_v9  ;;  %vm2014_vm8 = vweird.f32 %v2005_v9 }
 0x59c   :  { %3008 = vrcp.f32 %v2006_v11  ;;  %v2035_v25 = vand.u32 2147483648, %v2006_v11  ;;  %v2033_v28 = vand.u32 2147483647, %v2006_v11  ;;  %vm2029_vm9 = vweird.f32 %v2006_v11 }
 0x59d   :  { %3010 = vpow2.f32 %v2771_v1  ;;  %v2021_v32 = vor.u32 1.1754944e-38, %v2020_v26  ;;  %vm2019_vm13 = vcmp.eq.f32.partialorder %v2018_v24, 8.507059e+37  ;;  %v2100_v37 = vpop.f32.mrf.mxu3 }
 0x59e   :  { %v2036_v30 = vor.u32 1.1754944e-38, %v2035_v25  ;;  %vm2034_vm12 = vcmp.eq.f32.partialorder %v2033_v28, 8.507059e+37 }
 0x5a0   :  { %v3005_v12 = vpop.eup %3004 }
 0x5a1   :  { %v3007_v14 = vpop.eup %3006  ;;  %v2007_v16 = vadd.f32 1.0, %v3005_v12 }
 0x5a2   :  { %v3009_v18 = vpop.eup %3008  ;;  %v2010_v19 = vmul.f32 %v3007_v14, %v2005_v9  ;;  %vm2015_vm2 = vweird.f32 %v3007_v14 }
 0x5a3   :  { %v3011_v20 = vpop.eup %3010  ;;  %v2025_v21 = vmul.f32 %v3009_v18, %v2006_v11  ;;  %3012 = vrcp.f32 %v2007_v16  ;;  %vm2030_vm7 = vweird.f32 %v3009_v18  ;;  %vm2016_vm10 = vmor %vm2014_vm8, %vm2015_vm2  ;;  %v2050_v39 = vand.u32 2147483648, %v2007_v16 }
 0x5a4   :  { %v2008_v40 = vadd.f32 1.0, %v3011_v20  ;;  %v2011_v22 = vsub.f32 1.0, %v2010_v19  ;;  %vm2031_vm11 = vmor %vm2029_vm9, %vm2030_vm7  ;;  %v2048_v50 = vand.u32 2147483647, %v2007_v16  ;;  %vm2044_vm15 = vweird.f32 %v2007_v16 }
 0x5a5   :  { %v2026_v23 = vsub.f32 1.0, %v2025_v21  ;;  %v2051_v59 = vor.u32 1.1754944e-38, %v2050_v39  ;;  %v2103_v46 = vpop.f32.mrf.mxu3 }
 0x5a6   :  { %3014 = vrcp.f32 %v2008_v40  ;;  %v2012_v15 = vmul.f32 %v3007_v14, %v2011_v22  ;;  %v2065_v54 = vand.u32 2147483648, %v2008_v40  ;;  %v2063_v57 = vand.u32 2147483647, %v2008_v40 }
 0x5a7   :  { %v2027_v27 = vmul.f32 %v3009_v18, %v2026_v23  ;;  %vm2049_vm4 = vcmp.eq.f32.partialorder %v2048_v50, 8.507059e+37  ;;  %vm2059_vm5 = vweird.f32 %v2008_v40 }
 0x5a8   :  { %v2013_v29 = vadd.f32 %v3007_v14, %v2012_v15  ;;  %vm2064_vm2 = vcmp.eq.f32.partialorder %v2063_v57, 8.507059e+37 }
 0x5a9   :  { %v3013_v6 = vpop.eup %3012  ;;  %v2028_v13 = vadd.f32 %v3009_v18, %v2027_v27 }
 0x5aa   :  { %v2040_v33 = vmul.f32 %v3013_v6, %v2007_v16  ;;  %v2017_v36 = vsel %vm2016_vm10, %v3007_v14, %v2013_v29  ;;  %vm2045_vm14 = vweird.f32 %v3013_v6 }
 0x5ab   :  { %v2032_v35 = vsel %vm2031_vm11, %v3009_v18, %v2028_v13  ;;  %v2022_v42 = vsel %vm2019_vm13, %v2021_v32, %v2017_v36  ;;  %vm2046_vm3 = vmor %vm2044_vm15, %vm2045_vm14 }
 0x5ac   :  { %v3015_v38 = vpop.eup %3014  ;;  %v2037_v41 = vsel %vm2034_vm12, %v2036_v30, %v2032_v35  ;;  %v2041_v45 = vsub.f32 1.0, %v2040_v33  ;;  %v2069_v48 = vmul.f32 %v2022_v42, %v4422_v60 }
 0x5ad   :  { %v2070_v17 = vmul.f32 %v2037_v41, %v4424_v61  ;;  %v2055_v10 = vmul.f32 %v3015_v38, %v2008_v40  ;;  %vm2060_vm1 = vweird.f32 %v3015_v38  ;;  %v2066_v61 = vor.u32 1.1754944e-38, %v2065_v54 }
 0x5ae   :  { %v2042_v49 = vmul.f32 %v3013_v6, %v2041_v45  ;;  %v2129_v53 = vmul.f32 %v2100_v37, %v2069_v48  ;;  %vm2061_vm6 = vmor %vm2059_vm5, %vm2060_vm1 }
 0x5af   :  { %v2130_v51 = vmul.f32 %v2123_v43, %v2070_v17  ;;  %v2056_v52 = vsub.f32 1.0, %v2055_v10 }
 0x5b0   :  { %v2043_v55 = vadd.f32 %v3013_v6, %v2042_v49  ;;  %2150 = vmatmul.f32.vlgmr.msra.gmra.mxu1 %v2129_v53 }
 0x5b1   :  { %v2057_v56 = vmul.f32 %v3015_v38, %v2056_v52  ;;  %2173 = vmatmul.f32.vlgmr.msrb.gmra.mxu2 %v2130_v51 }
 0x5b2   :  { %v2047_v31 = vsel %vm2046_vm3, %v3013_v6, %v2043_v55 }
 0x5b3   :  { %v2058_v34 = vadd.f32 %v3015_v38, %v2057_v56  ;;  %v2052_v60 = vsel %vm2049_vm4, %v2051_v59, %v2047_v31 }
 0x5b4   :  { %v2071_v62 = vmul.f32 %v2052_v60, %v4440_v44 }
 0x5b5   :  { %v2062_v63 = vsel %vm2061_vm6, %v3015_v38, %v2058_v34 }
 0x5b6   :  { %v2067_v0 = vsel %vm2064_vm2, %v2066_v61, %v2062_v63  ;;  %v2131_v2 = vmul.f32 %v2103_v46, %v2071_v62 }
 0x5b7   :  { %v2072_v3 = vmul.f32 %v2067_v0, %v4442_v47 }
 0x5b8   :  { %2153 = vmatmul.f32.gmra.mxu1 %v2131_v2 }
 0x5b9   :  { %v2132_v5 = vmul.f32 %v2126_v4, %v2072_v3 }
 0x5bb   :  { %2176 = vmatmul.f32.gmra.mxu2 %v2132_v5 }
 0x62d   :  { %v2151_v8 = vpop.f32.mrf.mxu1 }
 0x62e   :  { %v2152_v58 = vadd.f32 %v2923_v7, %v2151_v8 }
 0x634   :  { %v2174_v9 = vpop.f32.mrf.mxu2 }
 0x635   :  { %v2175_v1 = vadd.f32 %v2174_v9, %v2152_v58  ;;  %v2154_v44 = vpop.f32.mrf.mxu1 }
 0x636   :  { %v2155_v11 = vadd.f32 %v2923_v7, %v2154_v44 }
 0x637   :  { %2180 = vst.msk [vmem:[%s4466_s5] sm:$0xff] %vm1228_vm0, %v2175_v1 }
 0x63e   :  { %v2177_v47 = vpop.f32.mrf.mxu2 }
 0x63f   :  { %v2178_v12 = vadd.f32 %v2177_v47, %v2155_v11 }
 0x641   :  { %2181 = vst.msk [vmem:[%s4466_s5 + $0x8] sm:$0xff] %vm1228_vm0, %v2178_v12 }

</bundles_post_ra>
